<compile_context>
chip_gen: v7x
topology: tpu7x:2x2x1
jax: 0.10.0
libtpu: 0.0.40
codegen_flags: <defaults>
</compile_context>

<pallas_src>
import jax
import jax.numpy as jnp
import numpy as np
from jax import lax
from jax.experimental import pallas as pl
from jax.experimental.pallas import tpu as pltpu

EPS = 1e-5
K1, S1, P1 = (41, 11), (2, 2), (20, 5)   # conv1 / projection1 window params
K2, S2, P2 = (21, 11), (2, 1), (10, 5)   # conv2 / projection2 window params

# Phase-decomposed (stride folded into channels) kernel extents.
KH1P, KW1P, CP1 = 21, 6, 8     # ceil(41/2), ceil(11/2), channels (1*2*2 -> pad 8)
KH2P, KW2P, CP2 = 11, 11, 72   # ceil(21/2), 11,         channels (33*2   -> pad 72)


# ----------------------------- Pallas kernel ---------------------------------
def _make_stage_kernel(kh_p, kw_p, c_out, t_out):
    """Stride-1 conv over a VMEM-resident phase block + affine + hardtanh + mask."""

    def kernel(len_ref, x_ref, w_ref, sc_ref, sh_ref, o_ref):
        # x_ref : (Dph, Cp, Tph) bf16   resident per batch element
        # w_ref : (kh_p, c_out, kw_p*Cp) bf16   resident across the whole grid
        # sc/sh : (c_out, 1) f32
        # o_ref : (1, c_out, t_out) f32
        b = pl.program_id(0)
        do = pl.program_id(1)

        acc = jnp.zeros((c_out, t_out), jnp.float32)
        for r in range(kh_p):                       # unrolled: 21 / 11 taps rows
            row = x_ref[do + r]                     # (Cp, Tph) — cheap offset load
            rhs = jnp.concatenate(
                [row[:, s:s + t_out] for s in range(kw_p)], axis=0)   # (kw_p*Cp, t_out)
            acc = acc + jnp.dot(w_ref[r], rhs,
                                preferred_element_type=jnp.float32)   # MXU, f32 acc

        y = acc * sc_ref[...] + sh_ref[...]         # conv bias + inference BN
        y = jnp.clip(y, 0.0, 20.0)                  # Hardtanh(0, 20)
        t_idx = lax.broadcasted_iota(jnp.int32, (c_out, t_out), 1)
        o_ref[0] = jnp.where(t_idx < len_ref[b], y, 0.0)   # MaskConv time mask

    return kernel


def conv_stage(xph, w_k, sc, sh, lengths, d_out, t_out):
    B, d_ph, c_p, t_ph = xph.shape
    kh_p, c_out, k_r = w_k.shape
    kw_p = k_r // c_p
    kernel = _make_stage_kernel(kh_p, kw_p, c_out, t_out)
    return pl.pallas_call(
        kernel,
        out_shape=jax.ShapeDtypeStruct((B, d_out, c_out, t_out), jnp.float32),
        grid_spec=pltpu.PrefetchScalarGridSpec(
            num_scalar_prefetch=1,                  # lengths -> SMEM
            grid=(B, d_out),                        # d innermost: x re-DMA only per batch
            in_specs=[
                pl.BlockSpec((None, d_ph, c_p, t_ph), lambda b, d, lens: (b, 0, 0, 0)),
                pl.BlockSpec((kh_p, c_out, k_r), lambda b, d, lens: (0, 0, 0)),
                pl.BlockSpec((c_out, 1), lambda b, d, lens: (0, 0)),
                pl.BlockSpec((c_out, 1), lambda b, d, lens: (0, 0)),
            ],
            out_specs=pl.BlockSpec((None, 1, c_out, t_out),
                                   lambda b, d, lens: (b, d, 0, 0)),
        ),
        compiler_params=pltpu.CompilerParams(
            dimension_semantics=("parallel", "parallel"),
            vmem_limit_bytes=48 * 1024 * 1024,      # headroom on v7x (64 MiB), > v5e default
        ),
    )(lengths, xph, w_k, sc, sh)


# ------------------------- host-side phase packing ----------------------------
def phase_input_stage1(x, d_ph, t_ph):
    """(B,1,D,T) -> (B, Dph, 8, Tph) bf16 with channel = 2*q + u (D/T stride-2 phases)."""
    B, _, D, T = x.shape
    xs = x[:, 0]
    xs = jnp.pad(xs, ((0, 0),
                      (P1[0], 2 * d_ph - D - P1[0]),
                      (P1[1], 2 * t_ph - T - P1[1])))
    xs = xs.reshape(B, d_ph, 2, t_ph, 2)                      # (b, d', q, t', u)
    xs = xs.transpose(0, 1, 2, 4, 3).reshape(B, d_ph, 4, t_ph)
    xs = jnp.pad(xs, ((0, 0), (0, 0), (0, CP1 - 4), (0, 0)))  # channel pad 4 -> 8
    return xs.astype(jnp.bfloat16)


def phase_input_stage2(y1, d_ph, t_ph):
    """(B,d1,33,t1) stage-1 output -> (B, Dph, 72, Tph) bf16 with channel = q*33 + c."""
    B, d1, C, t1 = y1.shape
    yp = jnp.pad(y1, ((0, 0),
                      (P2[0], 2 * d_ph - d1 - P2[0]),
                      (0, 0),
                      (P2[1], t_ph - t1 - P2[1])))
    yp = yp.reshape(B, d_ph, 2 * C, t_ph)                     # pure reshape: (d', q, c)
    yp = jnp.pad(yp, ((0, 0), (0, 0), (0, CP2 - 2 * C), (0, 0)))
    return yp.astype(jnp.bfloat16)


# ------------------------------ parameters -------------------------------------
def init_params(key):
    ks = jax.random.split(key, 16)
    p = {}
    p["W1"] = 0.05 * jax.random.normal(ks[0], (32, 1) + K1, jnp.float32)
    p["b1"] = 0.05 * jax.random.normal(ks[1], (32,), jnp.float32)
    p["W2"] = 0.02 * jax.random.normal(ks[2], (32, 33) + K2, jnp.float32)
    p["b2"] = 0.05 * jax.random.normal(ks[3], (32,), jnp.float32)

    def bn(n, k0):
        return (1.0 + 0.1 * jax.random.normal(ks[k0], (n,), jnp.float32),
                0.1 * jax.random.normal(ks[k0 + 1], (n,), jnp.float32),
                0.1 * jax.random.normal(ks[k0 + 2], (n,), jnp.float32),
                0.5 + jax.random.uniform(ks[k0 + 3], (n,), jnp.float32))

    p["g1"], p["be1"], p["m1"], p["v1"] = bn(32, 4)    # BN after conv1
    p["g2"], p["be2"], p["m2"], p["v2"] = bn(32, 8)    # BN after conv2
    p["g3"], p["be3"], p["m3"], p["v3"] = bn(33, 12)   # BN inside projection2
    return p


def build_stage_consts(p):
    # ---- stage 1: output channels = [avgpool(1) | conv1(32)] = 33 ----
    kA1 = K1[0] * K1[1]
    pool1 = jnp.full((1, 1) + K1, 1.0 / kA1, jnp.float32)          # count_include_pad
    W1e = jnp.concatenate([pool1, p["W1"]], axis=0)                # (33, 1, 41, 11)
    Wp = jnp.zeros((33, KH1P, KW1P, CP1), jnp.float32)
    for q in range(2):
        for u in range(2):
            sub = W1e[:, 0, q::2, u::2]                            # (33, nr, nc)
            Wp = Wp.at[:, :sub.shape[1], :sub.shape[2], 2 * q + u].set(sub)
    w1k = Wp.transpose(1, 0, 2, 3).reshape(KH1P, 33, KW1P * CP1).astype(jnp.bfloat16)
    s1 = p["g1"] / jnp.sqrt(p["v1"] + EPS)
    sc1 = jnp.concatenate([jnp.ones((1,), jnp.float32), s1])[:, None]
    sh1 = jnp.concatenate([jnp.zeros((1,), jnp.float32),
                           p["be1"] + (p["b1"] - p["m1"]) * s1])[:, None]

    # ---- stage 2: output channels = [avgpool(33)+BN3 | conv2(32)+BN2] = 65 ----
    kA2 = K2[0] * K2[1]
    pool2 = (jnp.eye(33, dtype=jnp.float32)[:, :, None, None]
             * jnp.ones((1, 1) + K2, jnp.float32) / kA2)           # (33, 33, 21, 11)
    W2e = jnp.concatenate([pool2, p["W2"]], axis=0)                # (65, 33, 21, 11)
    Wp2 = jnp.zeros((65, KH2P, KW2P, CP2), jnp.float32)
    for q in range(2):
        sub = W2e[:, :, q::2, :]                                   # (65, 33, nr, 11)
        nr = sub.shape[2]
        Wp2 = Wp2.at[:, :nr, :, q * 33:(q + 1) * 33].set(sub.transpose(0, 2, 3, 1))
    w2k = Wp2.transpose(1, 0, 2, 3).reshape(KH2P, 65, KW2P * CP2).astype(jnp.bfloat16)
    s3 = p["g3"] / jnp.sqrt(p["v3"] + EPS)
    s2 = p["g2"] / jnp.sqrt(p["v2"] + EPS)
    sc2 = jnp.concatenate([s3, s2])[:, None]
    sh2 = jnp.concatenate([p["be3"] - p["m3"] * s3,
                           p["be2"] + (p["b2"] - p["m2"]) * s2])[:, None]
    return (w1k, sc1.astype(jnp.float32), sh1.astype(jnp.float32)), \
           (w2k, sc2.astype(jnp.float32), sh2.astype(jnp.float32))


# ------------------------------ full forward -----------------------------------
def dense_step1(x, lengths, params):
    """x: (B, 1, D, T) float32, lengths: (B,) int. Returns ((B, 65, D2, T2), out_lengths)."""
    lengths = lengths.astype(jnp.int32)
    B, _, D, T = x.shape
    (w1k, sc1, sh1), (w2k, sc2, sh2) = build_stage_consts(params)

    d1 = (D + 2 * P1[0] - K1[0]) // S1[0] + 1
    t1 = (T + 2 * P1[1] - K1[1]) // S1[1] + 1
    xph1 = phase_input_stage1(x, d1 + KH1P - 1, t1 + KW1P - 1)
    y1 = conv_stage(xph1, w1k, sc1, sh1, lengths, d1, t1)     # (B, d1, 33, t1)

    d2 = (d1 + 2 * P2[0] - K2[0]) // S2[0] + 1
    t2 = (t1 + 2 * P2[1] - K2[1]) // S2[1] + 1
    xph2 = phase_input_stage2(y1, d2 + KH2P - 1, t2 + KW2P - 1)
    y2 = conv_stage(xph2, w2k, sc2, sh2, lengths, d2, t2)     # (B, d2, 65, t2)

    out = y2.transpose(0, 2, 1, 3)                            # -> NCHW (B, 65, d2, t2)

    # get_seq_lens over the two Conv2d modules (time-axis params: k=11, pad=5, dil=1).
    out_len = (lengths + 2 * P1[1] - (K1[1] - 1) - 1) // S1[1] + 1
    out_len = (out_len + 2 * P2[1] - (K2[1] - 1) - 1) // S2[1] + 1
    return out, out_len.astype(jnp.int32)


# --------------------------- pure-JAX reference --------------------------------
def reference(x, lengths, p):
    def mask_t(y):
        T = y.shape[3]
        keep = jnp.arange(T)[None, :] < lengths[:, None]
        return jnp.where(keep[:, None, None, :], y, 0.0)

    def bn(y, g, b, m, v):
        s = (g / jnp.sqrt(v + EPS))[None, :, None, None]
        return (y - m[None, :, None, None]) * s + b[None, :, None, None]

    dn = ("NCHW", "OIHW", "NCHW")
    hp = lax.Precision.HIGHEST
    c1 = lax.conv_general_dilated(x, p["W1"], S1, [(20, 20), (5, 5)],
                                  dimension_numbers=dn, precision=hp) + p["b1"][None, :, None, None]
    c1 = mask_t(c1); c1 = mask_t(bn(c1, p["g1"], p["be1"], p["m1"], p["v1"]))
    c1 = mask_t(jnp.clip(c1, 0.0, 20.0))
    a1 = lax.reduce_window(x, 0.0, lax.add, (1, 1, 41, 11), (1, 1, 2, 2),
                           [(0, 0), (0, 0), (20, 20), (5, 5)]) / (41 * 11)
    a1 = mask_t(a1); a1 = mask_t(jnp.clip(a1, 0.0, 20.0))
    x1 = jnp.concatenate([a1, c1], axis=1)

    c2 = lax.conv_general_dilated(x1, p["W2"], S2, [(10, 10), (5, 5)],
                                  dimension_numbers=dn, precision=hp) + p["b2"][None, :, None, None]
    c2 = mask_t(c2); c2 = mask_t(bn(c2, p["g2"], p["be2"], p["m2"], p["v2"]))
    c2 = mask_t(jnp.clip(c2, 0.0, 20.0))
    a2 = lax.reduce_window(x1, 0.0, lax.add, (1, 1, 21, 11), (1, 1, 2, 1),
                           [(0, 0), (0, 0), (10, 10), (5, 5)]) / (21 * 11)
    a2 = mask_t(a2); a2 = mask_t(bn(a2, p["g3"], p["be3"], p["m3"], p["v3"]))
    a2 = mask_t(jnp.clip(a2, 0.0, 20.0))
    x2 = jnp.concatenate([a2, c2], axis=1)
    out_len = (lengths - 1) // 2 + 1
    return x2, out_len.astype(jnp.int32)


if __name__ == "__main__":
    key = jax.random.PRNGKey(0)
    kx, kp = jax.random.split(key)
    B, D, T = 2, 16, 256
    x = jax.random.normal(kx, (B, 1, D, T), jnp.float32)
    lengths = jnp.array([256, 100], dtype=jnp.int32)   # second < t_out -> exercises masking
    params = init_params(kp)

    out, out_len = jax.block_until_ready(dense_step1(x, lengths, params))

    ref_out, ref_len = reference(x, lengths, params)
    np.testing.assert_allclose(np.asarray(out), np.asarray(ref_out), rtol=5e-2, atol=5e-2)
    assert np.array_equal(np.asarray(out_len), np.asarray(ref_len))
    print("KERNEL_OK")
</pallas_src>

<mosaic_0001>
module attributes {stable_mosaic.version = 11 : i64} {
  func.func @kernel(%arg0: i32, %arg1: i32, %arg2: memref<2xi32, #tpu.memory_space<smem>>, %arg3: memref<1x28x8x133xbf16, #tpu.memory_space<vmem>>, %arg4: memref<21x33x48xbf16, #tpu.memory_space<vmem>>, %arg5: memref<33x1xf32, #tpu.memory_space<vmem>>, %arg6: memref<33x1xf32, #tpu.memory_space<vmem>>, %arg7: memref<1x1x33x128xf32, #tpu.memory_space<vmem>>) attributes {dimension_semantics = [#tpu.dimension_semantics<parallel>, #tpu.dimension_semantics<parallel>], iteration_bounds = array<i64: 2, 8>, scalar_prefetch = 1 : i64, scratch_operands = 0 : i64, tpu.core_type = #tpu.core_type<tc>, window_params = [{transform_indices = @transform_0, window_bounds = array<i64: 1, 28, 8, 133>}, {pipeline_mode = #tpu.pipeline_mode<synchronous>, transform_indices = @transform_1, window_bounds = array<i64: 21, 33, 48>}, {pipeline_mode = #tpu.pipeline_mode<synchronous>, transform_indices = @transform_2, window_bounds = array<i64: 33, 1>}, {pipeline_mode = #tpu.pipeline_mode<synchronous>, transform_indices = @transform_3, window_bounds = array<i64: 33, 1>}, {transform_indices = @transform_4, window_bounds = array<i64: 1, 1, 33, 128>}]} {
    %cst = arith.constant 0.000000e+00 : f32
    %0 = vector.broadcast %cst : f32 to vector<33x128xf32>
    %c0_i32 = arith.constant 0 : i32
    %1 = arith.addi %arg1, %c0_i32 : i32
    %c0 = arith.constant 0 : index
    %2 = arith.index_cast %1 : i32 to index
    %c0_0 = arith.constant 0 : index
    %c0_1 = arith.constant 0 : index
    %3 = vector.load %arg3[%c0, %2, %c0_0, %c0_1] : memref<1x28x8x133xbf16, #tpu.memory_space<vmem>>, vector<1x1x8x133xbf16>
    %4 = vector.shape_cast %3 : vector<1x1x8x133xbf16> to vector<8x133xbf16>
    %5 = vector.extract_strided_slice %4 {offsets = [0, 0], sizes = [8, 128], strides = [1, 1]} : vector<8x133xbf16> to vector<8x128xbf16>
    %6 = vector.extract_strided_slice %4 {offsets = [0, 1], sizes = [8, 128], strides = [1, 1]} : vector<8x133xbf16> to vector<8x128xbf16>
    %7 = vector.extract_strided_slice %4 {offsets = [0, 2], sizes = [8, 128], strides = [1, 1]} : vector<8x133xbf16> to vector<8x128xbf16>
    %8 = vector.extract_strided_slice %4 {offsets = [0, 3], sizes = [8, 128], strides = [1, 1]} : vector<8x133xbf16> to vector<8x128xbf16>
    %9 = vector.extract_strided_slice %4 {offsets = [0, 4], sizes = [8, 128], strides = [1, 1]} : vector<8x133xbf16> to vector<8x128xbf16>
    %10 = vector.extract_strided_slice %4 {offsets = [0, 5], sizes = [8, 128], strides = [1, 1]} : vector<8x133xbf16> to vector<8x128xbf16>
    %11 = tpu.concatenate %5, %6, %7, %8, %9, %10 in 0 : vector<8x128xbf16>, vector<8x128xbf16>, vector<8x128xbf16>, vector<8x128xbf16>, vector<8x128xbf16>, vector<8x128xbf16> -> vector<48x128xbf16>
    %c0_2 = arith.constant 0 : index
    %c0_3 = arith.constant 0 : index
    %c0_4 = arith.constant 0 : index
    %12 = vector.load %arg4[%c0_2, %c0_3, %c0_4] : memref<21x33x48xbf16, #tpu.memory_space<vmem>>, vector<1x33x48xbf16>
    %13 = vector.shape_cast %12 : vector<1x33x48xbf16> to vector<33x48xbf16>
    %cst_5 = arith.constant dense<0.000000e+00> : vector<33x128xf32>
    %14 = tpu.matmul %13, %11, %cst_5 {dimension_numbers = #tpu.dot_dimension_numbers<[1], [0], [0], [1], [0, 0, 1, 1], [], []>} : vector<33x48xbf16>, vector<48x128xbf16>, vector<33x128xf32> -> vector<33x128xf32>
    %15 = arith.addf %0, %14 : vector<33x128xf32>
    %c1_i32 = arith.constant 1 : i32
    %16 = arith.addi %arg1, %c1_i32 : i32
    %c0_6 = arith.constant 0 : index
    %17 = arith.index_cast %16 : i32 to index
    %c0_7 = arith.constant 0 : index
    %c0_8 = arith.constant 0 : index
    %18 = vector.load %arg3[%c0_6, %17, %c0_7, %c0_8] : memref<1x28x8x133xbf16, #tpu.memory_space<vmem>>, vector<1x1x8x133xbf16>
    %19 = vector.shape_cast %18 : vector<1x1x8x133xbf16> to vector<8x133xbf16>
    %20 = vector.extract_strided_slice %19 {offsets = [0, 0], sizes = [8, 128], strides = [1, 1]} : vector<8x133xbf16> to vector<8x128xbf16>
    %21 = vector.extract_strided_slice %19 {offsets = [0, 1], sizes = [8, 128], strides = [1, 1]} : vector<8x133xbf16> to vector<8x128xbf16>
    %22 = vector.extract_strided_slice %19 {offsets = [0, 2], sizes = [8, 128], strides = [1, 1]} : vector<8x133xbf16> to vector<8x128xbf16>
    %23 = vector.extract_strided_slice %19 {offsets = [0, 3], sizes = [8, 128], strides = [1, 1]} : vector<8x133xbf16> to vector<8x128xbf16>
    %24 = vector.extract_strided_slice %19 {offsets = [0, 4], sizes = [8, 128], strides = [1, 1]} : vector<8x133xbf16> to vector<8x128xbf16>
    %25 = vector.extract_strided_slice %19 {offsets = [0, 5], sizes = [8, 128], strides = [1, 1]} : vector<8x133xbf16> to vector<8x128xbf16>
    %26 = tpu.concatenate %20, %21, %22, %23, %24, %25 in 0 : vector<8x128xbf16>, vector<8x128xbf16>, vector<8x128xbf16>, vector<8x128xbf16>, vector<8x128xbf16>, vector<8x128xbf16> -> vector<48x128xbf16>
    %c1 = arith.constant 1 : index
    %c0_9 = arith.constant 0 : index
    %c0_10 = arith.constant 0 : index
    %27 = vector.load %arg4[%c1, %c0_9, %c0_10] : memref<21x33x48xbf16, #tpu.memory_space<vmem>>, vector<1x33x48xbf16>
    %28 = vector.shape_cast %27 : vector<1x33x48xbf16> to vector<33x48xbf16>
    %cst_11 = arith.constant dense<0.000000e+00> : vector<33x128xf32>
    %29 = tpu.matmul %28, %26, %cst_11 {dimension_numbers = #tpu.dot_dimension_numbers<[1], [0], [0], [1], [0, 0, 1, 1], [], []>} : vector<33x48xbf16>, vector<48x128xbf16>, vector<33x128xf32> -> vector<33x128xf32>
    %30 = arith.addf %15, %29 : vector<33x128xf32>
    %c2_i32 = arith.constant 2 : i32
    %31 = arith.addi %arg1, %c2_i32 : i32
    %c0_12 = arith.constant 0 : index
    %32 = arith.index_cast %31 : i32 to index
    %c0_13 = arith.constant 0 : index
    %c0_14 = arith.constant 0 : index
    %33 = vector.load %arg3[%c0_12, %32, %c0_13, %c0_14] : memref<1x28x8x133xbf16, #tpu.memory_space<vmem>>, vector<1x1x8x133xbf16>
    %34 = vector.shape_cast %33 : vector<1x1x8x133xbf16> to vector<8x133xbf16>
    %35 = vector.extract_strided_slice %34 {offsets = [0, 0], sizes = [8, 128], strides = [1, 1]} : vector<8x133xbf16> to vector<8x128xbf16>
    %36 = vector.extract_strided_slice %34 {offsets = [0, 1], sizes = [8, 128], strides = [1, 1]} : vector<8x133xbf16> to vector<8x128xbf16>
    %37 = vector.extract_strided_slice %34 {offsets = [0, 2], sizes = [8, 128], strides = [1, 1]} : vector<8x133xbf16> to vector<8x128xbf16>
    %38 = vector.extract_strided_slice %34 {offsets = [0, 3], sizes = [8, 128], strides = [1, 1]} : vector<8x133xbf16> to vector<8x128xbf16>
    %39 = vector.extract_strided_slice %34 {offsets = [0, 4], sizes = [8, 128], strides = [1, 1]} : vector<8x133xbf16> to vector<8x128xbf16>
    %40 = vector.extract_strided_slice %34 {offsets = [0, 5], sizes = [8, 128], strides = [1, 1]} : vector<8x133xbf16> to vector<8x128xbf16>
    %41 = tpu.concatenate %35, %36, %37, %38, %39, %40 in 0 : vector<8x128xbf16>, vector<8x128xbf16>, vector<8x128xbf16>, vector<8x128xbf16>, vector<8x128xbf16>, vector<8x128xbf16> -> vector<48x128xbf16>
    %c2 = arith.constant 2 : index
    %c0_15 = arith.constant 0 : index
    %c0_16 = arith.constant 0 : index
    %42 = vector.load %arg4[%c2, %c0_15, %c0_16] : memref<21x33x48xbf16, #tpu.memory_space<vmem>>, vector<1x33x48xbf16>
    %43 = vector.shape_cast %42 : vector<1x33x48xbf16> to vector<33x48xbf16>
    %cst_17 = arith.constant dense<0.000000e+00> : vector<33x128xf32>
    %44 = tpu.matmul %43, %41, %cst_17 {dimension_numbers = #tpu.dot_dimension_numbers<[1], [0], [0], [1], [0, 0, 1, 1], [], []>} : vector<33x48xbf16>, vector<48x128xbf16>, vector<33x128xf32> -> vector<33x128xf32>
    %45 = arith.addf %30, %44 : vector<33x128xf32>
    %c3_i32 = arith.constant 3 : i32
    %46 = arith.addi %arg1, %c3_i32 : i32
    %c0_18 = arith.constant 0 : index
    %47 = arith.index_cast %46 : i32 to index
    %c0_19 = arith.constant 0 : index
    %c0_20 = arith.constant 0 : index
    %48 = vector.load %arg3[%c0_18, %47, %c0_19, %c0_20] : memref<1x28x8x133xbf16, #tpu.memory_space<vmem>>, vector<1x1x8x133xbf16>
    %49 = vector.shape_cast %48 : vector<1x1x8x133xbf16> to vector<8x133xbf16>
    %50 = vector.extract_strided_slice %49 {offsets = [0, 0], sizes = [8, 128], strides = [1, 1]} : vector<8x133xbf16> to vector<8x128xbf16>
    %51 = vector.extract_strided_slice %49 {offsets = [0, 1], sizes = [8, 128], strides = [1, 1]} : vector<8x133xbf16> to vector<8x128xbf16>
    %52 = vector.extract_strided_slice %49 {offsets = [0, 2], sizes = [8, 128], strides = [1, 1]} : vector<8x133xbf16> to vector<8x128xbf16>
    %53 = vector.extract_strided_slice %49 {offsets = [0, 3], sizes = [8, 128], strides = [1, 1]} : vector<8x133xbf16> to vector<8x128xbf16>
    %54 = vector.extract_strided_slice %49 {offsets = [0, 4], sizes = [8, 128], strides = [1, 1]} : vector<8x133xbf16> to vector<8x128xbf16>
    %55 = vector.extract_strided_slice %49 {offsets = [0, 5], sizes = [8, 128], strides = [1, 1]} : vector<8x133xbf16> to vector<8x128xbf16>
    %56 = tpu.concatenate %50, %51, %52, %53, %54, %55 in 0 : vector<8x128xbf16>, vector<8x128xbf16>, vector<8x128xbf16>, vector<8x128xbf16>, vector<8x128xbf16>, vector<8x128xbf16> -> vector<48x128xbf16>
    %c3 = arith.constant 3 : index
    %c0_21 = arith.constant 0 : index
    %c0_22 = arith.constant 0 : index
    %57 = vector.load %arg4[%c3, %c0_21, %c0_22] : memref<21x33x48xbf16, #tpu.memory_space<vmem>>, vector<1x33x48xbf16>
    %58 = vector.shape_cast %57 : vector<1x33x48xbf16> to vector<33x48xbf16>
    %cst_23 = arith.constant dense<0.000000e+00> : vector<33x128xf32>
    %59 = tpu.matmul %58, %56, %cst_23 {dimension_numbers = #tpu.dot_dimension_numbers<[1], [0], [0], [1], [0, 0, 1, 1], [], []>} : vector<33x48xbf16>, vector<48x128xbf16>, vector<33x128xf32> -> vector<33x128xf32>
    %60 = arith.addf %45, %59 : vector<33x128xf32>
    %c4_i32 = arith.constant 4 : i32
    %61 = arith.addi %arg1, %c4_i32 : i32
    %c0_24 = arith.constant 0 : index
    %62 = arith.index_cast %61 : i32 to index
    %c0_25 = arith.constant 0 : index
    %c0_26 = arith.constant 0 : index
    %63 = vector.load %arg3[%c0_24, %62, %c0_25, %c0_26] : memref<1x28x8x133xbf16, #tpu.memory_space<vmem>>, vector<1x1x8x133xbf16>
    %64 = vector.shape_cast %63 : vector<1x1x8x133xbf16> to vector<8x133xbf16>
    %65 = vector.extract_strided_slice %64 {offsets = [0, 0], sizes = [8, 128], strides = [1, 1]} : vector<8x133xbf16> to vector<8x128xbf16>
    %66 = vector.extract_strided_slice %64 {offsets = [0, 1], sizes = [8, 128], strides = [1, 1]} : vector<8x133xbf16> to vector<8x128xbf16>
    %67 = vector.extract_strided_slice %64 {offsets = [0, 2], sizes = [8, 128], strides = [1, 1]} : vector<8x133xbf16> to vector<8x128xbf16>
    %68 = vector.extract_strided_slice %64 {offsets = [0, 3], sizes = [8, 128], strides = [1, 1]} : vector<8x133xbf16> to vector<8x128xbf16>
    %69 = vector.extract_strided_slice %64 {offsets = [0, 4], sizes = [8, 128], strides = [1, 1]} : vector<8x133xbf16> to vector<8x128xbf16>
    %70 = vector.extract_strided_slice %64 {offsets = [0, 5], sizes = [8, 128], strides = [1, 1]} : vector<8x133xbf16> to vector<8x128xbf16>
    %71 = tpu.concatenate %65, %66, %67, %68, %69, %70 in 0 : vector<8x128xbf16>, vector<8x128xbf16>, vector<8x128xbf16>, vector<8x128xbf16>, vector<8x128xbf16>, vector<8x128xbf16> -> vector<48x128xbf16>
    %c4 = arith.constant 4 : index
    %c0_27 = arith.constant 0 : index
    %c0_28 = arith.constant 0 : index
    %72 = vector.load %arg4[%c4, %c0_27, %c0_28] : memref<21x33x48xbf16, #tpu.memory_space<vmem>>, vector<1x33x48xbf16>
    %73 = vector.shape_cast %72 : vector<1x33x48xbf16> to vector<33x48xbf16>
    %cst_29 = arith.constant dense<0.000000e+00> : vector<33x128xf32>
    %74 = tpu.matmul %73, %71, %cst_29 {dimension_numbers = #tpu.dot_dimension_numbers<[1], [0], [0], [1], [0, 0, 1, 1], [], []>} : vector<33x48xbf16>, vector<48x128xbf16>, vector<33x128xf32> -> vector<33x128xf32>
    %75 = arith.addf %60, %74 : vector<33x128xf32>
    %c5_i32 = arith.constant 5 : i32
    %76 = arith.addi %arg1, %c5_i32 : i32
    %c0_30 = arith.constant 0 : index
    %77 = arith.index_cast %76 : i32 to index
    %c0_31 = arith.constant 0 : index
    %c0_32 = arith.constant 0 : index
    %78 = vector.load %arg3[%c0_30, %77, %c0_31, %c0_32] : memref<1x28x8x133xbf16, #tpu.memory_space<vmem>>, vector<1x1x8x133xbf16>
    %79 = vector.shape_cast %78 : vector<1x1x8x133xbf16> to vector<8x133xbf16>
    %80 = vector.extract_strided_slice %79 {offsets = [0, 0], sizes = [8, 128], strides = [1, 1]} : vector<8x133xbf16> to vector<8x128xbf16>
    %81 = vector.extract_strided_slice %79 {offsets = [0, 1], sizes = [8, 128], strides = [1, 1]} : vector<8x133xbf16> to vector<8x128xbf16>
    %82 = vector.extract_strided_slice %79 {offsets = [0, 2], sizes = [8, 128], strides = [1, 1]} : vector<8x133xbf16> to vector<8x128xbf16>
    %83 = vector.extract_strided_slice %79 {offsets = [0, 3], sizes = [8, 128], strides = [1, 1]} : vector<8x133xbf16> to vector<8x128xbf16>
    %84 = vector.extract_strided_slice %79 {offsets = [0, 4], sizes = [8, 128], strides = [1, 1]} : vector<8x133xbf16> to vector<8x128xbf16>
    %85 = vector.extract_strided_slice %79 {offsets = [0, 5], sizes = [8, 128], strides = [1, 1]} : vector<8x133xbf16> to vector<8x128xbf16>
    %86 = tpu.concatenate %80, %81, %82, %83, %84, %85 in 0 : vector<8x128xbf16>, vector<8x128xbf16>, vector<8x128xbf16>, vector<8x128xbf16>, vector<8x128xbf16>, vector<8x128xbf16> -> vector<48x128xbf16>
    %c5 = arith.constant 5 : index
    %c0_33 = arith.constant 0 : index
    %c0_34 = arith.constant 0 : index
    %87 = vector.load %arg4[%c5, %c0_33, %c0_34] : memref<21x33x48xbf16, #tpu.memory_space<vmem>>, vector<1x33x48xbf16>
    %88 = vector.shape_cast %87 : vector<1x33x48xbf16> to vector<33x48xbf16>
    %cst_35 = arith.constant dense<0.000000e+00> : vector<33x128xf32>
    %89 = tpu.matmul %88, %86, %cst_35 {dimension_numbers = #tpu.dot_dimension_numbers<[1], [0], [0], [1], [0, 0, 1, 1], [], []>} : vector<33x48xbf16>, vector<48x128xbf16>, vector<33x128xf32> -> vector<33x128xf32>
    %90 = arith.addf %75, %89 : vector<33x128xf32>
    %c6_i32 = arith.constant 6 : i32
    %91 = arith.addi %arg1, %c6_i32 : i32
    %c0_36 = arith.constant 0 : index
    %92 = arith.index_cast %91 : i32 to index
    %c0_37 = arith.constant 0 : index
    %c0_38 = arith.constant 0 : index
    %93 = vector.load %arg3[%c0_36, %92, %c0_37, %c0_38] : memref<1x28x8x133xbf16, #tpu.memory_space<vmem>>, vector<1x1x8x133xbf16>
    %94 = vector.shape_cast %93 : vector<1x1x8x133xbf16> to vector<8x133xbf16>
    %95 = vector.extract_strided_slice %94 {offsets = [0, 0], sizes = [8, 128], strides = [1, 1]} : vector<8x133xbf16> to vector<8x128xbf16>
    %96 = vector.extract_strided_slice %94 {offsets = [0, 1], sizes = [8, 128], strides = [1, 1]} : vector<8x133xbf16> to vector<8x128xbf16>
    %97 = vector.extract_strided_slice %94 {offsets = [0, 2], sizes = [8, 128], strides = [1, 1]} : vector<8x133xbf16> to vector<8x128xbf16>
    %98 = vector.extract_strided_slice %94 {offsets = [0, 3], sizes = [8, 128], strides = [1, 1]} : vector<8x133xbf16> to vector<8x128xbf16>
    %99 = vector.extract_strided_slice %94 {offsets = [0, 4], sizes = [8, 128], strides = [1, 1]} : vector<8x133xbf16> to vector<8x128xbf16>
    %100 = vector.extract_strided_slice %94 {offsets = [0, 5], sizes = [8, 128], strides = [1, 1]} : vector<8x133xbf16> to vector<8x128xbf16>
    %101 = tpu.concatenate %95, %96, %97, %98, %99, %100 in 0 : vector<8x128xbf16>, vector<8x128xbf16>, vector<8x128xbf16>, vector<8x128xbf16>, vector<8x128xbf16>, vector<8x128xbf16> -> vector<48x128xbf16>
    %c6 = arith.constant 6 : index
    %c0_39 = arith.constant 0 : index
    %c0_40 = arith.constant 0 : index
    %102 = vector.load %arg4[%c6, %c0_39, %c0_40] : memref<21x33x48xbf16, #tpu.memory_space<vmem>>, vector<1x33x48xbf16>
    %103 = vector.shape_cast %102 : vector<1x33x48xbf16> to vector<33x48xbf16>
    %cst_41 = arith.constant dense<0.000000e+00> : vector<33x128xf32>
    %104 = tpu.matmul %103, %101, %cst_41 {dimension_numbers = #tpu.dot_dimension_numbers<[1], [0], [0], [1], [0, 0, 1, 1], [], []>} : vector<33x48xbf16>, vector<48x128xbf16>, vector<33x128xf32> -> vector<33x128xf32>
    %105 = arith.addf %90, %104 : vector<33x128xf32>
    %c7_i32 = arith.constant 7 : i32
    %106 = arith.addi %arg1, %c7_i32 : i32
    %c0_42 = arith.constant 0 : index
    %107 = arith.index_cast %106 : i32 to index
    %c0_43 = arith.constant 0 : index
    %c0_44 = arith.constant 0 : index
    %108 = vector.load %arg3[%c0_42, %107, %c0_43, %c0_44] : memref<1x28x8x133xbf16, #tpu.memory_space<vmem>>, vector<1x1x8x133xbf16>
    %109 = vector.shape_cast %108 : vector<1x1x8x133xbf16> to vector<8x133xbf16>
    %110 = vector.extract_strided_slice %109 {offsets = [0, 0], sizes = [8, 128], strides = [1, 1]} : vector<8x133xbf16> to vector<8x128xbf16>
    %111 = vector.extract_strided_slice %109 {offsets = [0, 1], sizes = [8, 128], strides = [1, 1]} : vector<8x133xbf16> to vector<8x128xbf16>
    %112 = vector.extract_strided_slice %109 {offsets = [0, 2], sizes = [8, 128], strides = [1, 1]} : vector<8x133xbf16> to vector<8x128xbf16>
    %113 = vector.extract_strided_slice %109 {offsets = [0, 3], sizes = [8, 128], strides = [1, 1]} : vector<8x133xbf16> to vector<8x128xbf16>
    %114 = vector.extract_strided_slice %109 {offsets = [0, 4], sizes = [8, 128], strides = [1, 1]} : vector<8x133xbf16> to vector<8x128xbf16>
    %115 = vector.extract_strided_slice %109 {offsets = [0, 5], sizes = [8, 128], strides = [1, 1]} : vector<8x133xbf16> to vector<8x128xbf16>
    %116 = tpu.concatenate %110, %111, %112, %113, %114, %115 in 0 : vector<8x128xbf16>, vector<8x128xbf16>, vector<8x128xbf16>, vector<8x128xbf16>, vector<8x128xbf16>, vector<8x128xbf16> -> vector<48x128xbf16>
    %c7 = arith.constant 7 : index
    %c0_45 = arith.constant 0 : index
    %c0_46 = arith.constant 0 : index
    %117 = vector.load %arg4[%c7, %c0_45, %c0_46] : memref<21x33x48xbf16, #tpu.memory_space<vmem>>, vector<1x33x48xbf16>
    %118 = vector.shape_cast %117 : vector<1x33x48xbf16> to vector<33x48xbf16>
    %cst_47 = arith.constant dense<0.000000e+00> : vector<33x128xf32>
    %119 = tpu.matmul %118, %116, %cst_47 {dimension_numbers = #tpu.dot_dimension_numbers<[1], [0], [0], [1], [0, 0, 1, 1], [], []>} : vector<33x48xbf16>, vector<48x128xbf16>, vector<33x128xf32> -> vector<33x128xf32>
    %120 = arith.addf %105, %119 : vector<33x128xf32>
    %c8_i32 = arith.constant 8 : i32
    %121 = arith.addi %arg1, %c8_i32 : i32
    %c0_48 = arith.constant 0 : index
    %122 = arith.index_cast %121 : i32 to index
    %c0_49 = arith.constant 0 : index
    %c0_50 = arith.constant 0 : index
    %123 = vector.load %arg3[%c0_48, %122, %c0_49, %c0_50] : memref<1x28x8x133xbf16, #tpu.memory_space<vmem>>, vector<1x1x8x133xbf16>
    %124 = vector.shape_cast %123 : vector<1x1x8x133xbf16> to vector<8x133xbf16>
    %125 = vector.extract_strided_slice %124 {offsets = [0, 0], sizes = [8, 128], strides = [1, 1]} : vector<8x133xbf16> to vector<8x128xbf16>
    %126 = vector.extract_strided_slice %124 {offsets = [0, 1], sizes = [8, 128], strides = [1, 1]} : vector<8x133xbf16> to vector<8x128xbf16>
    %127 = vector.extract_strided_slice %124 {offsets = [0, 2], sizes = [8, 128], strides = [1, 1]} : vector<8x133xbf16> to vector<8x128xbf16>
    %128 = vector.extract_strided_slice %124 {offsets = [0, 3], sizes = [8, 128], strides = [1, 1]} : vector<8x133xbf16> to vector<8x128xbf16>
    %129 = vector.extract_strided_slice %124 {offsets = [0, 4], sizes = [8, 128], strides = [1, 1]} : vector<8x133xbf16> to vector<8x128xbf16>
    %130 = vector.extract_strided_slice %124 {offsets = [0, 5], sizes = [8, 128], strides = [1, 1]} : vector<8x133xbf16> to vector<8x128xbf16>
    %131 = tpu.concatenate %125, %126, %127, %128, %129, %130 in 0 : vector<8x128xbf16>, vector<8x128xbf16>, vector<8x128xbf16>, vector<8x128xbf16>, vector<8x128xbf16>, vector<8x128xbf16> -> vector<48x128xbf16>
    %c8 = arith.constant 8 : index
    %c0_51 = arith.constant 0 : index
    %c0_52 = arith.constant 0 : index
    %132 = vector.load %arg4[%c8, %c0_51, %c0_52] : memref<21x33x48xbf16, #tpu.memory_space<vmem>>, vector<1x33x48xbf16>
    %133 = vector.shape_cast %132 : vector<1x33x48xbf16> to vector<33x48xbf16>
    %cst_53 = arith.constant dense<0.000000e+00> : vector<33x128xf32>
    %134 = tpu.matmul %133, %131, %cst_53 {dimension_numbers = #tpu.dot_dimension_numbers<[1], [0], [0], [1], [0, 0, 1, 1], [], []>} : vector<33x48xbf16>, vector<48x128xbf16>, vector<33x128xf32> -> vector<33x128xf32>
    %135 = arith.addf %120, %134 : vector<33x128xf32>
    %c9_i32 = arith.constant 9 : i32
    %136 = arith.addi %arg1, %c9_i32 : i32
    %c0_54 = arith.constant 0 : index
    %137 = arith.index_cast %136 : i32 to index
    %c0_55 = arith.constant 0 : index
    %c0_56 = arith.constant 0 : index
    %138 = vector.load %arg3[%c0_54, %137, %c0_55, %c0_56] : memref<1x28x8x133xbf16, #tpu.memory_space<vmem>>, vector<1x1x8x133xbf16>
    %139 = vector.shape_cast %138 : vector<1x1x8x133xbf16> to vector<8x133xbf16>
    %140 = vector.extract_strided_slice %139 {offsets = [0, 0], sizes = [8, 128], strides = [1, 1]} : vector<8x133xbf16> to vector<8x128xbf16>
    %141 = vector.extract_strided_slice %139 {offsets = [0, 1], sizes = [8, 128], strides = [1, 1]} : vector<8x133xbf16> to vector<8x128xbf16>
    %142 = vector.extract_strided_slice %139 {offsets = [0, 2], sizes = [8, 128], strides = [1, 1]} : vector<8x133xbf16> to vector<8x128xbf16>
    %143 = vector.extract_strided_slice %139 {offsets = [0, 3], sizes = [8, 128], strides = [1, 1]} : vector<8x133xbf16> to vector<8x128xbf16>
    %144 = vector.extract_strided_slice %139 {offsets = [0, 4], sizes = [8, 128], strides = [1, 1]} : vector<8x133xbf16> to vector<8x128xbf16>
    %145 = vector.extract_strided_slice %139 {offsets = [0, 5], sizes = [8, 128], strides = [1, 1]} : vector<8x133xbf16> to vector<8x128xbf16>
    %146 = tpu.concatenate %140, %141, %142, %143, %144, %145 in 0 : vector<8x128xbf16>, vector<8x128xbf16>, vector<8x128xbf16>, vector<8x128xbf16>, vector<8x128xbf16>, vector<8x128xbf16> -> vector<48x128xbf16>
    %c9 = arith.constant 9 : index
    %c0_57 = arith.constant 0 : index
    %c0_58 = arith.constant 0 : index
    %147 = vector.load %arg4[%c9, %c0_57, %c0_58] : memref<21x33x48xbf16, #tpu.memory_space<vmem>>, vector<1x33x48xbf16>
    %148 = vector.shape_cast %147 : vector<1x33x48xbf16> to vector<33x48xbf16>
    %cst_59 = arith.constant dense<0.000000e+00> : vector<33x128xf32>
    %149 = tpu.matmul %148, %146, %cst_59 {dimension_numbers = #tpu.dot_dimension_numbers<[1], [0], [0], [1], [0, 0, 1, 1], [], []>} : vector<33x48xbf16>, vector<48x128xbf16>, vector<33x128xf32> -> vector<33x128xf32>
    %150 = arith.addf %135, %149 : vector<33x128xf32>
    %c10_i32 = arith.constant 10 : i32
    %151 = arith.addi %arg1, %c10_i32 : i32
    %c0_60 = arith.constant 0 : index
    %152 = arith.index_cast %151 : i32 to index
    %c0_61 = arith.constant 0 : index
    %c0_62 = arith.constant 0 : index
    %153 = vector.load %arg3[%c0_60, %152, %c0_61, %c0_62] : memref<1x28x8x133xbf16, #tpu.memory_space<vmem>>, vector<1x1x8x133xbf16>
    %154 = vector.shape_cast %153 : vector<1x1x8x133xbf16> to vector<8x133xbf16>
    %155 = vector.extract_strided_slice %154 {offsets = [0, 0], sizes = [8, 128], strides = [1, 1]} : vector<8x133xbf16> to vector<8x128xbf16>
    %156 = vector.extract_strided_slice %154 {offsets = [0, 1], sizes = [8, 128], strides = [1, 1]} : vector<8x133xbf16> to vector<8x128xbf16>
    %157 = vector.extract_strided_slice %154 {offsets = [0, 2], sizes = [8, 128], strides = [1, 1]} : vector<8x133xbf16> to vector<8x128xbf16>
    %158 = vector.extract_strided_slice %154 {offsets = [0, 3], sizes = [8, 128], strides = [1, 1]} : vector<8x133xbf16> to vector<8x128xbf16>
    %159 = vector.extract_strided_slice %154 {offsets = [0, 4], sizes = [8, 128], strides = [1, 1]} : vector<8x133xbf16> to vector<8x128xbf16>
    %160 = vector.extract_strided_slice %154 {offsets = [0, 5], sizes = [8, 128], strides = [1, 1]} : vector<8x133xbf16> to vector<8x128xbf16>
    %161 = tpu.concatenate %155, %156, %157, %158, %159, %160 in 0 : vector<8x128xbf16>, vector<8x128xbf16>, vector<8x128xbf16>, vector<8x128xbf16>, vector<8x128xbf16>, vector<8x128xbf16> -> vector<48x128xbf16>
    %c10 = arith.constant 10 : index
    %c0_63 = arith.constant 0 : index
    %c0_64 = arith.constant 0 : index
    %162 = vector.load %arg4[%c10, %c0_63, %c0_64] : memref<21x33x48xbf16, #tpu.memory_space<vmem>>, vector<1x33x48xbf16>
    %163 = vector.shape_cast %162 : vector<1x33x48xbf16> to vector<33x48xbf16>
    %cst_65 = arith.constant dense<0.000000e+00> : vector<33x128xf32>
    %164 = tpu.matmul %163, %161, %cst_65 {dimension_numbers = #tpu.dot_dimension_numbers<[1], [0], [0], [1], [0, 0, 1, 1], [], []>} : vector<33x48xbf16>, vector<48x128xbf16>, vector<33x128xf32> -> vector<33x128xf32>
    %165 = arith.addf %150, %164 : vector<33x128xf32>
    %c11_i32 = arith.constant 11 : i32
    %166 = arith.addi %arg1, %c11_i32 : i32
    %c0_66 = arith.constant 0 : index
    %167 = arith.index_cast %166 : i32 to index
    %c0_67 = arith.constant 0 : index
    %c0_68 = arith.constant 0 : index
    %168 = vector.load %arg3[%c0_66, %167, %c0_67, %c0_68] : memref<1x28x8x133xbf16, #tpu.memory_space<vmem>>, vector<1x1x8x133xbf16>
    %169 = vector.shape_cast %168 : vector<1x1x8x133xbf16> to vector<8x133xbf16>
    %170 = vector.extract_strided_slice %169 {offsets = [0, 0], sizes = [8, 128], strides = [1, 1]} : vector<8x133xbf16> to vector<8x128xbf16>
    %171 = vector.extract_strided_slice %169 {offsets = [0, 1], sizes = [8, 128], strides = [1, 1]} : vector<8x133xbf16> to vector<8x128xbf16>
    %172 = vector.extract_strided_slice %169 {offsets = [0, 2], sizes = [8, 128], strides = [1, 1]} : vector<8x133xbf16> to vector<8x128xbf16>
    %173 = vector.extract_strided_slice %169 {offsets = [0, 3], sizes = [8, 128], strides = [1, 1]} : vector<8x133xbf16> to vector<8x128xbf16>
    %174 = vector.extract_strided_slice %169 {offsets = [0, 4], sizes = [8, 128], strides = [1, 1]} : vector<8x133xbf16> to vector<8x128xbf16>
    %175 = vector.extract_strided_slice %169 {offsets = [0, 5], sizes = [8, 128], strides = [1, 1]} : vector<8x133xbf16> to vector<8x128xbf16>
    %176 = tpu.concatenate %170, %171, %172, %173, %174, %175 in 0 : vector<8x128xbf16>, vector<8x128xbf16>, vector<8x128xbf16>, vector<8x128xbf16>, vector<8x128xbf16>, vector<8x128xbf16> -> vector<48x128xbf16>
    %c11 = arith.constant 11 : index
    %c0_69 = arith.constant 0 : index
    %c0_70 = arith.constant 0 : index
    %177 = vector.load %arg4[%c11, %c0_69, %c0_70] : memref<21x33x48xbf16, #tpu.memory_space<vmem>>, vector<1x33x48xbf16>
    %178 = vector.shape_cast %177 : vector<1x33x48xbf16> to vector<33x48xbf16>
    %cst_71 = arith.constant dense<0.000000e+00> : vector<33x128xf32>
    %179 = tpu.matmul %178, %176, %cst_71 {dimension_numbers = #tpu.dot_dimension_numbers<[1], [0], [0], [1], [0, 0, 1, 1], [], []>} : vector<33x48xbf16>, vector<48x128xbf16>, vector<33x128xf32> -> vector<33x128xf32>
    %180 = arith.addf %165, %179 : vector<33x128xf32>
    %c12_i32 = arith.constant 12 : i32
    %181 = arith.addi %arg1, %c12_i32 : i32
    %c0_72 = arith.constant 0 : index
    %182 = arith.index_cast %181 : i32 to index
    %c0_73 = arith.constant 0 : index
    %c0_74 = arith.constant 0 : index
    %183 = vector.load %arg3[%c0_72, %182, %c0_73, %c0_74] : memref<1x28x8x133xbf16, #tpu.memory_space<vmem>>, vector<1x1x8x133xbf16>
    %184 = vector.shape_cast %183 : vector<1x1x8x133xbf16> to vector<8x133xbf16>
    %185 = vector.extract_strided_slice %184 {offsets = [0, 0], sizes = [8, 128], strides = [1, 1]} : vector<8x133xbf16> to vector<8x128xbf16>
    %186 = vector.extract_strided_slice %184 {offsets = [0, 1], sizes = [8, 128], strides = [1, 1]} : vector<8x133xbf16> to vector<8x128xbf16>
    %187 = vector.extract_strided_slice %184 {offsets = [0, 2], sizes = [8, 128], strides = [1, 1]} : vector<8x133xbf16> to vector<8x128xbf16>
    %188 = vector.extract_strided_slice %184 {offsets = [0, 3], sizes = [8, 128], strides = [1, 1]} : vector<8x133xbf16> to vector<8x128xbf16>
    %189 = vector.extract_strided_slice %184 {offsets = [0, 4], sizes = [8, 128], strides = [1, 1]} : vector<8x133xbf16> to vector<8x128xbf16>
    %190 = vector.extract_strided_slice %184 {offsets = [0, 5], sizes = [8, 128], strides = [1, 1]} : vector<8x133xbf16> to vector<8x128xbf16>
    %191 = tpu.concatenate %185, %186, %187, %188, %189, %190 in 0 : vector<8x128xbf16>, vector<8x128xbf16>, vector<8x128xbf16>, vector<8x128xbf16>, vector<8x128xbf16>, vector<8x128xbf16> -> vector<48x128xbf16>
    %c12 = arith.constant 12 : index
    %c0_75 = arith.constant 0 : index
    %c0_76 = arith.constant 0 : index
    %192 = vector.load %arg4[%c12, %c0_75, %c0_76] : memref<21x33x48xbf16, #tpu.memory_space<vmem>>, vector<1x33x48xbf16>
    %193 = vector.shape_cast %192 : vector<1x33x48xbf16> to vector<33x48xbf16>
    %cst_77 = arith.constant dense<0.000000e+00> : vector<33x128xf32>
    %194 = tpu.matmul %193, %191, %cst_77 {dimension_numbers = #tpu.dot_dimension_numbers<[1], [0], [0], [1], [0, 0, 1, 1], [], []>} : vector<33x48xbf16>, vector<48x128xbf16>, vector<33x128xf32> -> vector<33x128xf32>
    %195 = arith.addf %180, %194 : vector<33x128xf32>
    %c13_i32 = arith.constant 13 : i32
    %196 = arith.addi %arg1, %c13_i32 : i32
    %c0_78 = arith.constant 0 : index
    %197 = arith.index_cast %196 : i32 to index
    %c0_79 = arith.constant 0 : index
    %c0_80 = arith.constant 0 : index
    %198 = vector.load %arg3[%c0_78, %197, %c0_79, %c0_80] : memref<1x28x8x133xbf16, #tpu.memory_space<vmem>>, vector<1x1x8x133xbf16>
    %199 = vector.shape_cast %198 : vector<1x1x8x133xbf16> to vector<8x133xbf16>
    %200 = vector.extract_strided_slice %199 {offsets = [0, 0], sizes = [8, 128], strides = [1, 1]} : vector<8x133xbf16> to vector<8x128xbf16>
    %201 = vector.extract_strided_slice %199 {offsets = [0, 1], sizes = [8, 128], strides = [1, 1]} : vector<8x133xbf16> to vector<8x128xbf16>
    %202 = vector.extract_strided_slice %199 {offsets = [0, 2], sizes = [8, 128], strides = [1, 1]} : vector<8x133xbf16> to vector<8x128xbf16>
    %203 = vector.extract_strided_slice %199 {offsets = [0, 3], sizes = [8, 128], strides = [1, 1]} : vector<8x133xbf16> to vector<8x128xbf16>
    %204 = vector.extract_strided_slice %199 {offsets = [0, 4], sizes = [8, 128], strides = [1, 1]} : vector<8x133xbf16> to vector<8x128xbf16>
    %205 = vector.extract_strided_slice %199 {offsets = [0, 5], sizes = [8, 128], strides = [1, 1]} : vector<8x133xbf16> to vector<8x128xbf16>
    %206 = tpu.concatenate %200, %201, %202, %203, %204, %205 in 0 : vector<8x128xbf16>, vector<8x128xbf16>, vector<8x128xbf16>, vector<8x128xbf16>, vector<8x128xbf16>, vector<8x128xbf16> -> vector<48x128xbf16>
    %c13 = arith.constant 13 : index
    %c0_81 = arith.constant 0 : index
    %c0_82 = arith.constant 0 : index
    %207 = vector.load %arg4[%c13, %c0_81, %c0_82] : memref<21x33x48xbf16, #tpu.memory_space<vmem>>, vector<1x33x48xbf16>
    %208 = vector.shape_cast %207 : vector<1x33x48xbf16> to vector<33x48xbf16>
    %cst_83 = arith.constant dense<0.000000e+00> : vector<33x128xf32>
    %209 = tpu.matmul %208, %206, %cst_83 {dimension_numbers = #tpu.dot_dimension_numbers<[1], [0], [0], [1], [0, 0, 1, 1], [], []>} : vector<33x48xbf16>, vector<48x128xbf16>, vector<33x128xf32> -> vector<33x128xf32>
    %210 = arith.addf %195, %209 : vector<33x128xf32>
    %c14_i32 = arith.constant 14 : i32
    %211 = arith.addi %arg1, %c14_i32 : i32
    %c0_84 = arith.constant 0 : index
    %212 = arith.index_cast %211 : i32 to index
    %c0_85 = arith.constant 0 : index
    %c0_86 = arith.constant 0 : index
    %213 = vector.load %arg3[%c0_84, %212, %c0_85, %c0_86] : memref<1x28x8x133xbf16, #tpu.memory_space<vmem>>, vector<1x1x8x133xbf16>
    %214 = vector.shape_cast %213 : vector<1x1x8x133xbf16> to vector<8x133xbf16>
    %215 = vector.extract_strided_slice %214 {offsets = [0, 0], sizes = [8, 128], strides = [1, 1]} : vector<8x133xbf16> to vector<8x128xbf16>
    %216 = vector.extract_strided_slice %214 {offsets = [0, 1], sizes = [8, 128], strides = [1, 1]} : vector<8x133xbf16> to vector<8x128xbf16>
    %217 = vector.extract_strided_slice %214 {offsets = [0, 2], sizes = [8, 128], strides = [1, 1]} : vector<8x133xbf16> to vector<8x128xbf16>
    %218 = vector.extract_strided_slice %214 {offsets = [0, 3], sizes = [8, 128], strides = [1, 1]} : vector<8x133xbf16> to vector<8x128xbf16>
    %219 = vector.extract_strided_slice %214 {offsets = [0, 4], sizes = [8, 128], strides = [1, 1]} : vector<8x133xbf16> to vector<8x128xbf16>
    %220 = vector.extract_strided_slice %214 {offsets = [0, 5], sizes = [8, 128], strides = [1, 1]} : vector<8x133xbf16> to vector<8x128xbf16>
    %221 = tpu.concatenate %215, %216, %217, %218, %219, %220 in 0 : vector<8x128xbf16>, vector<8x128xbf16>, vector<8x128xbf16>, vector<8x128xbf16>, vector<8x128xbf16>, vector<8x128xbf16> -> vector<48x128xbf16>
    %c14 = arith.constant 14 : index
    %c0_87 = arith.constant 0 : index
    %c0_88 = arith.constant 0 : index
    %222 = vector.load %arg4[%c14, %c0_87, %c0_88] : memref<21x33x48xbf16, #tpu.memory_space<vmem>>, vector<1x33x48xbf16>
    %223 = vector.shape_cast %222 : vector<1x33x48xbf16> to vector<33x48xbf16>
    %cst_89 = arith.constant dense<0.000000e+00> : vector<33x128xf32>
    %224 = tpu.matmul %223, %221, %cst_89 {dimension_numbers = #tpu.dot_dimension_numbers<[1], [0], [0], [1], [0, 0, 1, 1], [], []>} : vector<33x48xbf16>, vector<48x128xbf16>, vector<33x128xf32> -> vector<33x128xf32>
    %225 = arith.addf %210, %224 : vector<33x128xf32>
    %c15_i32 = arith.constant 15 : i32
    %226 = arith.addi %arg1, %c15_i32 : i32
    %c0_90 = arith.constant 0 : index
    %227 = arith.index_cast %226 : i32 to index
    %c0_91 = arith.constant 0 : index
    %c0_92 = arith.constant 0 : index
    %228 = vector.load %arg3[%c0_90, %227, %c0_91, %c0_92] : memref<1x28x8x133xbf16, #tpu.memory_space<vmem>>, vector<1x1x8x133xbf16>
    %229 = vector.shape_cast %228 : vector<1x1x8x133xbf16> to vector<8x133xbf16>
    %230 = vector.extract_strided_slice %229 {offsets = [0, 0], sizes = [8, 128], strides = [1, 1]} : vector<8x133xbf16> to vector<8x128xbf16>
    %231 = vector.extract_strided_slice %229 {offsets = [0, 1], sizes = [8, 128], strides = [1, 1]} : vector<8x133xbf16> to vector<8x128xbf16>
    %232 = vector.extract_strided_slice %229 {offsets = [0, 2], sizes = [8, 128], strides = [1, 1]} : vector<8x133xbf16> to vector<8x128xbf16>
    %233 = vector.extract_strided_slice %229 {offsets = [0, 3], sizes = [8, 128], strides = [1, 1]} : vector<8x133xbf16> to vector<8x128xbf16>
    %234 = vector.extract_strided_slice %229 {offsets = [0, 4], sizes = [8, 128], strides = [1, 1]} : vector<8x133xbf16> to vector<8x128xbf16>
    %235 = vector.extract_strided_slice %229 {offsets = [0, 5], sizes = [8, 128], strides = [1, 1]} : vector<8x133xbf16> to vector<8x128xbf16>
    %236 = tpu.concatenate %230, %231, %232, %233, %234, %235 in 0 : vector<8x128xbf16>, vector<8x128xbf16>, vector<8x128xbf16>, vector<8x128xbf16>, vector<8x128xbf16>, vector<8x128xbf16> -> vector<48x128xbf16>
    %c15 = arith.constant 15 : index
    %c0_93 = arith.constant 0 : index
    %c0_94 = arith.constant 0 : index
    %237 = vector.load %arg4[%c15, %c0_93, %c0_94] : memref<21x33x48xbf16, #tpu.memory_space<vmem>>, vector<1x33x48xbf16>
    %238 = vector.shape_cast %237 : vector<1x33x48xbf16> to vector<33x48xbf16>
    %cst_95 = arith.constant dense<0.000000e+00> : vector<33x128xf32>
    %239 = tpu.matmul %238, %236, %cst_95 {dimension_numbers = #tpu.dot_dimension_numbers<[1], [0], [0], [1], [0, 0, 1, 1], [], []>} : vector<33x48xbf16>, vector<48x128xbf16>, vector<33x128xf32> -> vector<33x128xf32>
    %240 = arith.addf %225, %239 : vector<33x128xf32>
    %c16_i32 = arith.constant 16 : i32
    %241 = arith.addi %arg1, %c16_i32 : i32
    %c0_96 = arith.constant 0 : index
    %242 = arith.index_cast %241 : i32 to index
    %c0_97 = arith.constant 0 : index
    %c0_98 = arith.constant 0 : index
    %243 = vector.load %arg3[%c0_96, %242, %c0_97, %c0_98] : memref<1x28x8x133xbf16, #tpu.memory_space<vmem>>, vector<1x1x8x133xbf16>
    %244 = vector.shape_cast %243 : vector<1x1x8x133xbf16> to vector<8x133xbf16>
    %245 = vector.extract_strided_slice %244 {offsets = [0, 0], sizes = [8, 128], strides = [1, 1]} : vector<8x133xbf16> to vector<8x128xbf16>
    %246 = vector.extract_strided_slice %244 {offsets = [0, 1], sizes = [8, 128], strides = [1, 1]} : vector<8x133xbf16> to vector<8x128xbf16>
    %247 = vector.extract_strided_slice %244 {offsets = [0, 2], sizes = [8, 128], strides = [1, 1]} : vector<8x133xbf16> to vector<8x128xbf16>
    %248 = vector.extract_strided_slice %244 {offsets = [0, 3], sizes = [8, 128], strides = [1, 1]} : vector<8x133xbf16> to vector<8x128xbf16>
    %249 = vector.extract_strided_slice %244 {offsets = [0, 4], sizes = [8, 128], strides = [1, 1]} : vector<8x133xbf16> to vector<8x128xbf16>
    %250 = vector.extract_strided_slice %244 {offsets = [0, 5], sizes = [8, 128], strides = [1, 1]} : vector<8x133xbf16> to vector<8x128xbf16>
    %251 = tpu.concatenate %245, %246, %247, %248, %249, %250 in 0 : vector<8x128xbf16>, vector<8x128xbf16>, vector<8x128xbf16>, vector<8x128xbf16>, vector<8x128xbf16>, vector<8x128xbf16> -> vector<48x128xbf16>
    %c16 = arith.constant 16 : index
    %c0_99 = arith.constant 0 : index
    %c0_100 = arith.constant 0 : index
    %252 = vector.load %arg4[%c16, %c0_99, %c0_100] : memref<21x33x48xbf16, #tpu.memory_space<vmem>>, vector<1x33x48xbf16>
    %253 = vector.shape_cast %252 : vector<1x33x48xbf16> to vector<33x48xbf16>
    %cst_101 = arith.constant dense<0.000000e+00> : vector<33x128xf32>
    %254 = tpu.matmul %253, %251, %cst_101 {dimension_numbers = #tpu.dot_dimension_numbers<[1], [0], [0], [1], [0, 0, 1, 1], [], []>} : vector<33x48xbf16>, vector<48x128xbf16>, vector<33x128xf32> -> vector<33x128xf32>
    %255 = arith.addf %240, %254 : vector<33x128xf32>
    %c17_i32 = arith.constant 17 : i32
    %256 = arith.addi %arg1, %c17_i32 : i32
    %c0_102 = arith.constant 0 : index
    %257 = arith.index_cast %256 : i32 to index
    %c0_103 = arith.constant 0 : index
    %c0_104 = arith.constant 0 : index
    %258 = vector.load %arg3[%c0_102, %257, %c0_103, %c0_104] : memref<1x28x8x133xbf16, #tpu.memory_space<vmem>>, vector<1x1x8x133xbf16>
    %259 = vector.shape_cast %258 : vector<1x1x8x133xbf16> to vector<8x133xbf16>
    %260 = vector.extract_strided_slice %259 {offsets = [0, 0], sizes = [8, 128], strides = [1, 1]} : vector<8x133xbf16> to vector<8x128xbf16>
    %261 = vector.extract_strided_slice %259 {offsets = [0, 1], sizes = [8, 128], strides = [1, 1]} : vector<8x133xbf16> to vector<8x128xbf16>
    %262 = vector.extract_strided_slice %259 {offsets = [0, 2], sizes = [8, 128], strides = [1, 1]} : vector<8x133xbf16> to vector<8x128xbf16>
    %263 = vector.extract_strided_slice %259 {offsets = [0, 3], sizes = [8, 128], strides = [1, 1]} : vector<8x133xbf16> to vector<8x128xbf16>
    %264 = vector.extract_strided_slice %259 {offsets = [0, 4], sizes = [8, 128], strides = [1, 1]} : vector<8x133xbf16> to vector<8x128xbf16>
    %265 = vector.extract_strided_slice %259 {offsets = [0, 5], sizes = [8, 128], strides = [1, 1]} : vector<8x133xbf16> to vector<8x128xbf16>
    %266 = tpu.concatenate %260, %261, %262, %263, %264, %265 in 0 : vector<8x128xbf16>, vector<8x128xbf16>, vector<8x128xbf16>, vector<8x128xbf16>, vector<8x128xbf16>, vector<8x128xbf16> -> vector<48x128xbf16>
    %c17 = arith.constant 17 : index
    %c0_105 = arith.constant 0 : index
    %c0_106 = arith.constant 0 : index
    %267 = vector.load %arg4[%c17, %c0_105, %c0_106] : memref<21x33x48xbf16, #tpu.memory_space<vmem>>, vector<1x33x48xbf16>
    %268 = vector.shape_cast %267 : vector<1x33x48xbf16> to vector<33x48xbf16>
    %cst_107 = arith.constant dense<0.000000e+00> : vector<33x128xf32>
    %269 = tpu.matmul %268, %266, %cst_107 {dimension_numbers = #tpu.dot_dimension_numbers<[1], [0], [0], [1], [0, 0, 1, 1], [], []>} : vector<33x48xbf16>, vector<48x128xbf16>, vector<33x128xf32> -> vector<33x128xf32>
    %270 = arith.addf %255, %269 : vector<33x128xf32>
    %c18_i32 = arith.constant 18 : i32
    %271 = arith.addi %arg1, %c18_i32 : i32
    %c0_108 = arith.constant 0 : index
    %272 = arith.index_cast %271 : i32 to index
    %c0_109 = arith.constant 0 : index
    %c0_110 = arith.constant 0 : index
    %273 = vector.load %arg3[%c0_108, %272, %c0_109, %c0_110] : memref<1x28x8x133xbf16, #tpu.memory_space<vmem>>, vector<1x1x8x133xbf16>
    %274 = vector.shape_cast %273 : vector<1x1x8x133xbf16> to vector<8x133xbf16>
    %275 = vector.extract_strided_slice %274 {offsets = [0, 0], sizes = [8, 128], strides = [1, 1]} : vector<8x133xbf16> to vector<8x128xbf16>
    %276 = vector.extract_strided_slice %274 {offsets = [0, 1], sizes = [8, 128], strides = [1, 1]} : vector<8x133xbf16> to vector<8x128xbf16>
    %277 = vector.extract_strided_slice %274 {offsets = [0, 2], sizes = [8, 128], strides = [1, 1]} : vector<8x133xbf16> to vector<8x128xbf16>
    %278 = vector.extract_strided_slice %274 {offsets = [0, 3], sizes = [8, 128], strides = [1, 1]} : vector<8x133xbf16> to vector<8x128xbf16>
    %279 = vector.extract_strided_slice %274 {offsets = [0, 4], sizes = [8, 128], strides = [1, 1]} : vector<8x133xbf16> to vector<8x128xbf16>
    %280 = vector.extract_strided_slice %274 {offsets = [0, 5], sizes = [8, 128], strides = [1, 1]} : vector<8x133xbf16> to vector<8x128xbf16>
    %281 = tpu.concatenate %275, %276, %277, %278, %279, %280 in 0 : vector<8x128xbf16>, vector<8x128xbf16>, vector<8x128xbf16>, vector<8x128xbf16>, vector<8x128xbf16>, vector<8x128xbf16> -> vector<48x128xbf16>
    %c18 = arith.constant 18 : index
    %c0_111 = arith.constant 0 : index
    %c0_112 = arith.constant 0 : index
    %282 = vector.load %arg4[%c18, %c0_111, %c0_112] : memref<21x33x48xbf16, #tpu.memory_space<vmem>>, vector<1x33x48xbf16>
    %283 = vector.shape_cast %282 : vector<1x33x48xbf16> to vector<33x48xbf16>
    %cst_113 = arith.constant dense<0.000000e+00> : vector<33x128xf32>
    %284 = tpu.matmul %283, %281, %cst_113 {dimension_numbers = #tpu.dot_dimension_numbers<[1], [0], [0], [1], [0, 0, 1, 1], [], []>} : vector<33x48xbf16>, vector<48x128xbf16>, vector<33x128xf32> -> vector<33x128xf32>
    %285 = arith.addf %270, %284 : vector<33x128xf32>
    %c19_i32 = arith.constant 19 : i32
    %286 = arith.addi %arg1, %c19_i32 : i32
    %c0_114 = arith.constant 0 : index
    %287 = arith.index_cast %286 : i32 to index
    %c0_115 = arith.constant 0 : index
    %c0_116 = arith.constant 0 : index
    %288 = vector.load %arg3[%c0_114, %287, %c0_115, %c0_116] : memref<1x28x8x133xbf16, #tpu.memory_space<vmem>>, vector<1x1x8x133xbf16>
    %289 = vector.shape_cast %288 : vector<1x1x8x133xbf16> to vector<8x133xbf16>
    %290 = vector.extract_strided_slice %289 {offsets = [0, 0], sizes = [8, 128], strides = [1, 1]} : vector<8x133xbf16> to vector<8x128xbf16>
    %291 = vector.extract_strided_slice %289 {offsets = [0, 1], sizes = [8, 128], strides = [1, 1]} : vector<8x133xbf16> to vector<8x128xbf16>
    %292 = vector.extract_strided_slice %289 {offsets = [0, 2], sizes = [8, 128], strides = [1, 1]} : vector<8x133xbf16> to vector<8x128xbf16>
    %293 = vector.extract_strided_slice %289 {offsets = [0, 3], sizes = [8, 128], strides = [1, 1]} : vector<8x133xbf16> to vector<8x128xbf16>
    %294 = vector.extract_strided_slice %289 {offsets = [0, 4], sizes = [8, 128], strides = [1, 1]} : vector<8x133xbf16> to vector<8x128xbf16>
    %295 = vector.extract_strided_slice %289 {offsets = [0, 5], sizes = [8, 128], strides = [1, 1]} : vector<8x133xbf16> to vector<8x128xbf16>
    %296 = tpu.concatenate %290, %291, %292, %293, %294, %295 in 0 : vector<8x128xbf16>, vector<8x128xbf16>, vector<8x128xbf16>, vector<8x128xbf16>, vector<8x128xbf16>, vector<8x128xbf16> -> vector<48x128xbf16>
    %c19 = arith.constant 19 : index
    %c0_117 = arith.constant 0 : index
    %c0_118 = arith.constant 0 : index
    %297 = vector.load %arg4[%c19, %c0_117, %c0_118] : memref<21x33x48xbf16, #tpu.memory_space<vmem>>, vector<1x33x48xbf16>
    %298 = vector.shape_cast %297 : vector<1x33x48xbf16> to vector<33x48xbf16>
    %cst_119 = arith.constant dense<0.000000e+00> : vector<33x128xf32>
    %299 = tpu.matmul %298, %296, %cst_119 {dimension_numbers = #tpu.dot_dimension_numbers<[1], [0], [0], [1], [0, 0, 1, 1], [], []>} : vector<33x48xbf16>, vector<48x128xbf16>, vector<33x128xf32> -> vector<33x128xf32>
    %300 = arith.addf %285, %299 : vector<33x128xf32>
    %c20_i32 = arith.constant 20 : i32
    %301 = arith.addi %arg1, %c20_i32 : i32
    %c0_120 = arith.constant 0 : index
    %302 = arith.index_cast %301 : i32 to index
    %c0_121 = arith.constant 0 : index
    %c0_122 = arith.constant 0 : index
    %303 = vector.load %arg3[%c0_120, %302, %c0_121, %c0_122] : memref<1x28x8x133xbf16, #tpu.memory_space<vmem>>, vector<1x1x8x133xbf16>
    %304 = vector.shape_cast %303 : vector<1x1x8x133xbf16> to vector<8x133xbf16>
    %305 = vector.extract_strided_slice %304 {offsets = [0, 0], sizes = [8, 128], strides = [1, 1]} : vector<8x133xbf16> to vector<8x128xbf16>
    %306 = vector.extract_strided_slice %304 {offsets = [0, 1], sizes = [8, 128], strides = [1, 1]} : vector<8x133xbf16> to vector<8x128xbf16>
    %307 = vector.extract_strided_slice %304 {offsets = [0, 2], sizes = [8, 128], strides = [1, 1]} : vector<8x133xbf16> to vector<8x128xbf16>
    %308 = vector.extract_strided_slice %304 {offsets = [0, 3], sizes = [8, 128], strides = [1, 1]} : vector<8x133xbf16> to vector<8x128xbf16>
    %309 = vector.extract_strided_slice %304 {offsets = [0, 4], sizes = [8, 128], strides = [1, 1]} : vector<8x133xbf16> to vector<8x128xbf16>
    %310 = vector.extract_strided_slice %304 {offsets = [0, 5], sizes = [8, 128], strides = [1, 1]} : vector<8x133xbf16> to vector<8x128xbf16>
    %311 = tpu.concatenate %305, %306, %307, %308, %309, %310 in 0 : vector<8x128xbf16>, vector<8x128xbf16>, vector<8x128xbf16>, vector<8x128xbf16>, vector<8x128xbf16>, vector<8x128xbf16> -> vector<48x128xbf16>
    %c20 = arith.constant 20 : index
    %c0_123 = arith.constant 0 : index
    %c0_124 = arith.constant 0 : index
    %312 = vector.load %arg4[%c20, %c0_123, %c0_124] : memref<21x33x48xbf16, #tpu.memory_space<vmem>>, vector<1x33x48xbf16>
    %313 = vector.shape_cast %312 : vector<1x33x48xbf16> to vector<33x48xbf16>
    %cst_125 = arith.constant dense<0.000000e+00> : vector<33x128xf32>
    %314 = tpu.matmul %313, %311, %cst_125 {dimension_numbers = #tpu.dot_dimension_numbers<[1], [0], [0], [1], [0, 0, 1, 1], [], []>} : vector<33x48xbf16>, vector<48x128xbf16>, vector<33x128xf32> -> vector<33x128xf32>
    %315 = arith.addf %300, %314 : vector<33x128xf32>
    %c0_126 = arith.constant 0 : index
    %c0_127 = arith.constant 0 : index
    %316 = vector.load %arg5[%c0_126, %c0_127] : memref<33x1xf32, #tpu.memory_space<vmem>>, vector<33x1xf32>
    %317 = vector.broadcast %316 : vector<33x1xf32> to vector<33x128xf32>
    %318 = arith.mulf %315, %317 : vector<33x128xf32>
    %c0_128 = arith.constant 0 : index
    %c0_129 = arith.constant 0 : index
    %319 = vector.load %arg6[%c0_128, %c0_129] : memref<33x1xf32, #tpu.memory_space<vmem>>, vector<33x1xf32>
    %320 = vector.broadcast %319 : vector<33x1xf32> to vector<33x128xf32>
    %321 = arith.addf %318, %320 : vector<33x128xf32>
    %cst_130 = arith.constant 0.000000e+00 : f32
    %cst_131 = arith.constant 2.000000e+01 : f32
    %322 = vector.broadcast %cst_130 : f32 to vector<33x128xf32>
    %323 = arith.maximumf %322, %321 : vector<33x128xf32>
    %324 = vector.broadcast %cst_131 : f32 to vector<33x128xf32>
    %325 = arith.minimumf %324, %323 : vector<33x128xf32>
    %326 = tpu.iota {dimensions = array<i32: 1>} : vector<33x128xi32>
    %327 = arith.index_cast %arg0 : i32 to index
    %328 = memref.load %arg2[%327] : memref<2xi32, #tpu.memory_space<smem>>
    %329 = vector.broadcast %328 : i32 to vector<33x128xi32>
    %330 = arith.cmpi slt, %326, %329 : vector<33x128xi32>
    %cst_132 = arith.constant 0.000000e+00 : f32
    %331 = vector.broadcast %cst_132 : f32 to vector<33x128xf32>
    %332 = arith.select %330, %325, %331 : vector<33x128xi1>, vector<33x128xf32>
    %c0_133 = arith.constant 0 : index
    %c0_134 = arith.constant 0 : index
    %c0_135 = arith.constant 0 : index
    %c0_136 = arith.constant 0 : index
    %333 = vector.load %arg7[%c0_133, %c0_134, %c0_135, %c0_136] : memref<1x1x33x128xf32, #tpu.memory_space<vmem>>, vector<1x1x33x128xf32>
    %334 = vector.shape_cast %333 : vector<1x1x33x128xf32> to vector<33x128xf32>
    %335 = vector.shape_cast %332 : vector<33x128xf32> to vector<1x1x33x128xf32>
    tpu.vector_store %arg7[%c0_133, %c0_134, %c0_135, %c0_136], %335 {strides = array<i32>} : memref<1x1x33x128xf32, #tpu.memory_space<vmem>>, vector<1x1x33x128xf32>,
    return
  }
  func.func @transform_0(%arg0: i32, %arg1: i32, %arg2: memref<2xi32, #tpu.memory_space<smem>>) -> (i32, i32, i32, i32) {
    %c0_i32 = arith.constant 0 : i32
    %c0_i32_0 = arith.constant 0 : i32
    %c0_i32_1 = arith.constant 0 : i32
    %c0_i32_2 = arith.constant 0 : i32
    return %arg0, %c0_i32, %c0_i32_0, %c0_i32_1 : i32, i32, i32, i32
  }
  func.func @transform_1(%arg0: i32, %arg1: i32, %arg2: memref<2xi32, #tpu.memory_space<smem>>) -> (i32, i32, i32) {
    %c0_i32 = arith.constant 0 : i32
    %c0_i32_0 = arith.constant 0 : i32
    %c0_i32_1 = arith.constant 0 : i32
    %c0_i32_2 = arith.constant 0 : i32
    return %c0_i32, %c0_i32_0, %c0_i32_1 : i32, i32, i32
  }
  func.func @transform_2(%arg0: i32, %arg1: i32, %arg2: memref<2xi32, #tpu.memory_space<smem>>) -> (i32, i32) {
    %c0_i32 = arith.constant 0 : i32
    %c0_i32_0 = arith.constant 0 : i32
    %c0_i32_1 = arith.constant 0 : i32
    return %c0_i32, %c0_i32_0 : i32, i32
  }
  func.func @transform_3(%arg0: i32, %arg1: i32, %arg2: memref<2xi32, #tpu.memory_space<smem>>) -> (i32, i32) {
    %c0_i32 = arith.constant 0 : i32
    %c0_i32_0 = arith.constant 0 : i32
    %c0_i32_1 = arith.constant 0 : i32
    return %c0_i32, %c0_i32_0 : i32, i32
  }
  func.func @transform_4(%arg0: i32, %arg1: i32, %arg2: memref<2xi32, #tpu.memory_space<smem>>) -> (i32, i32, i32, i32) {
    %c0_i32 = arith.constant 0 : i32
    %c0_i32_0 = arith.constant 0 : i32
    %c0_i32_1 = arith.constant 0 : i32
    return %arg0, %arg1, %c0_i32, %c0_i32_0 : i32, i32, i32, i32
  }
}

</mosaic_0001>

<bundles_post_ra>
// kernel: tpu_custom_call.1
= control target key start
LH: loop header
LB: loop body
LE: loop exit
PB: predicated region body
PF: predicated region fallthrough
CT: control target
= control target key end

     0   :  { %s5760_s0 = inlined_call_operand.vmem [shape: s32[2], index: 0, kind: input, shape index: {}]   ;;  %s5761_s1 = inlined_call_operand.vmem [shape: bf16[2,28,8,133], index: 1, kind: input, shape index: {}]   ;;  %s5762_s2 = inlined_call_operand.vmem [shape: bf16[21,33,48], index: 2, kind: input, shape index: {}]   ;;  %s5763_s3 = inlined_call_operand.vmem [shape: f32[33,1], index: 3, kind: input, shape index: {}]   ;;  %s5764_s4 = inlined_call_operand.vmem [shape: f32[33,1], index: 4, kind: input, shape index: {}]   ;;  %s5765_s5 = inlined_call_operand.vmem [shape: f32[2,8,33,128], index: 5, kind: output, shape index: {}]  }
   0x1   :  { %s10_s20 = sshll.u32 %s5760_s0, 4  ;;  %s11_s20 = int_to_ptr.vmem [resolvable:$true] %s10_s20 }
   0x2   :  { %s4544_s21 = scalar_lea.vmem %s11_s20, 16  ;;  %p4549_p1 = scmp.lt.s32.totalorder %s11_s20, %s11_s20 }
   0x3   :  { %p4545_p0 = scmp.ne.s32.totalorder %s11_s20, %s4544_s21  ;;  %p4550_p2 = scmp.lt.s32.totalorder %s4544_s21, %s4544_s21 }
   0x5   :  { %p4551_p3 = por %p4550_p2, %p4549_p1 }
   0x7   :  { %p4552_p4 = pnand %p4551_p3, %p4545_p0 }
   0x9   :  { %4555 = shalt.err (!%p4552_p4)  }
   0xa   :  { %s4598_s22 = smov [#allocation3]  }
   0xb   :  { %13 = dma.vmem_to_smem %s11_s20, 16, %s4598_s22, [#allocation2] }
   0xc   :  { %4576 = dma.done.wait [#allocation2], 16 }
   0xd   :  { %4577 = vsyncadd [#allocation2], 4294967280 }
   0xe   :  { %15 = sfence }
   0xf   :  { %s4640_s23 = smov 0   ;;  %s4642_s24 = smov 0  }
  0x10   :  { %s4644_s25 = smov 0   ;;  %s4646_s0 = smov 0  }
  0x11   :  { %s4648_s26 = smov 0  }
  0x12 LB: > { %s30_s27 = sadd.s32 1, %s4588_s25  ;;  %s33_s28 = sadd.s32 1, %s4592_s0  ;;  %s4596_s26 = sphi %s4648_s26, %s21_s26   ;;  %s4592_s0 = sphi %s4646_s0, %s5771_s0   ;;  %s4588_s25 = sphi %s4644_s25, %s5770_s25   ;;  %s4584_s24 = sphi %s4642_s24, %s5769_s24   ;;  %s4580_s23 = sphi %s4640_s23, %s5768_s23  }
  0x13   : > { %p31_p5 = scmp.ge.s32.totalorder %s30_s27, 8  ;;  %p3326_p6 = scmp.ge.s32.totalorder %s4596_s26, 1 }
  0x14   : > { %p183_p7 = scmp.lt.s32.totalorder %s4596_s26, 17 }
  0x15   : > { %s5773_s27 = smov (%p31_p5, %s30_s27), 0  ;;  %s5775_s28 = smov (!%p31_p5, %s33_s28), %s4592_s0 }
  0x16   : > { %p184_p8 = pnand %p3326_p6, %p183_p7  ;;  %p35_p9 = scmp.ge.s32.totalorder %s5775_s28, 2 }
  0x17   : > { %p213_p10 = scmp.lt.s32.totalorder (!%p184_p8), %s4584_s24, 1  ;;  %v4599_v0 = vmov (!%p184_p8), 0.0   ;;  %s3641_s6 = sshll.u32 (!%p184_p8), %s4580_s23, 3  ;;  %vm4605_vm0 = vmmov (!%p184_p8), 0   ;;  %vm241_vm1 = vcmask (!%p184_p8), 1039360   ;;  %vm267_vm2 = vcmask (!%p184_p8), 1043456  }
  0x18   : > { %s5777_s28 = smov (%p35_p9, %s5775_s28), 0  ;;  %187 = sbr.rel (%p184_p8) target bundleno = 816 (0x330), region = 36 }
  0x19   : > { %3768 = vmatprep.subr.bf16.mxu1 (!%p184_p8), %v4599_v0  ;;  %3948 = vmatprep.subr.bf16.mxu0 (!%p184_p8), %v4599_v0  ;;  %s4600_s11 = smov (!%p184_p8), 127   ;;  %s4601_s12 = smov (!%p184_p8), 126   ;;  %vm247_vm3 = vcmask (!%p184_p8), 1031168   ;;  %vm253_vm4 = vcmask (!%p184_p8), 1022976   ;;  %vm259_vm5 = vcmask (!%p184_p8), 1014784   ;;  %vm265_vm6 = vcmask (!%p184_p8), 1006592  }
  0x1a   : > { %s4602_s13 = smov (!%p184_p8), 125   ;;  %s4603_s14 = smov (!%p184_p8), 124   ;;  %3954 = vmatprep.mubr.msk.bf16.mxu0 (!%p184_p8), %vm4605_vm0, %v4599_v0  ;;  %3774 = vmatprep.mubr.msk.bf16.mxu1 (!%p184_p8), %vm4605_vm0, %v4599_v0  ;;  %v4455_v54 = vld [vmem:[%s5762_s2 + $0xc8] sm:$0xff] (!%p184_p8)   ;;  %vm351_vm7 = vcmask (!%p184_p8), 392192   ;;  %v4458_v63 = vld [vmem:[%s5762_s2 + $0x14] sm:$0xff] (!%p184_p8)  }
  0x1b   : > { %s4604_s15 = smov (!%p184_p8), 123   ;;  %p220_p11 = scmp.lt.s32.totalorder (!%p184_p8), %s4580_s23, 7 }
  0x1c   : > { %s3161_s18 = sld [smem:[#allocation3 + %s4584_s24]] (!%p184_p8) }
  0x1f   : > { %s4676_s29 = scalar_select %p213_p10, %s4584_s24, 1 }
  0x20   : > { %s5779_s23 = smov (!%p220_p11, %s4580_s23), 7 }
  0x21   : > { %s4385_s30 = smul.u32 224, %s4676_s29 }
  0x22   : > { %s4387_s19 = smul.u32 40, %s4676_s29 }
  0x23   : > { %s217_s9 = scalar_lea.vmem %s5761_s1, %s4385_s30  ;;  %s4386_s20 = smul.u32 5, %s5779_s23 }
  0x24   : > { %s4685_s10 = scalar_lea.vmem %s217_s9, %s3641_s6 }
  0x25   : > { %v4688_v1 = vld [vmem:[%s4685_s10 + $0x50] sm:$0xff]  ;;  %v4691_v2 = vld [vmem:[%s4685_s10 + $0x8] sm:$0xff]  ;;  %v4724_v7 = vld [vmem:[%s4685_s10 + $0x58] sm:$0xff]  ;;  %s224_s21 = sadd.s32 %s4387_s19, %s4386_s20 }
  0x26   : > { %v3476_v3 = vcombine.low %v4688_v1, %v4688_v1  ;;  %v3335_v4 = vcombine.low %v4691_v2, %v4691_v2  ;;  %v3477_v5 = vcombine.high %v4688_v1, %v4688_v1  ;;  %v3336_v6 = vcombine.high %v4691_v2, %v4691_v2  ;;  %v4741_v10 = vld [vmem:[%s4685_s10] sm:$0xff]  ;;  %v4775_v16 = vld [vmem:[%s4685_s10 + $0x10] sm:$0xff]  ;;  %v4792_v19 = vld [vmem:[%s4685_s10 + $0x68] sm:$0xff] }
  0x27   : > { %v3491_v8 = vcombine.low %v4724_v7, %v4724_v7  ;;  %v3492_v9 = vcombine.high %v4724_v7, %v4724_v7  ;;  %v3332_v11 = vcombine.high %v4741_v10, %v4741_v10  ;;  %v3331_v12 = vcombine.low %v4741_v10, %v4741_v10  ;;  %v4758_v13 = vld [vmem:[%s4685_s10 + $0x60] sm:$0xff]  ;;  %v4827_v39 = vld [vmem:[%s4685_s10 + $0x18] sm:$0xff]  ;;  %v4864_v62 = vld [vmem:[%s4685_s10 + $0x70] sm:$0xff] }
  0x28   : > { %1593 = vrot.lane.b32.xlu0 %v3476_v3, %s4600_s11  ;;  %295 = vrot.lane.b32.xlu1 %v3335_v4, %s4600_s11  ;;  %v3507_v14 = vcombine.high %v4758_v13, %v4758_v13  ;;  %v3506_v15 = vcombine.low %v4758_v13, %v4758_v13  ;;  %v3357_v17 = vcombine.high %v4775_v16, %v4775_v16 }
  0x29   : > { %v3356_v18 = vcombine.low %v4775_v16, %v4775_v16  ;;  %v3522_v22 = vcombine.high %v4792_v19, %v4792_v19  ;;  %v3521_v23 = vcombine.low %v4792_v19, %v4792_v19  ;;  %v3372_v45 = vcombine.high %v4827_v39, %v4827_v39 }
  0x2a   : > { %v3371_v46 = vcombine.low %v4827_v39, %v4827_v39 }
  0x2c   : > { %1595 = vrot.lane.b32.xlu0 %v3477_v5, %s4600_s11  ;;  %297 = vrot.lane.b32.xlu1 %v3336_v6, %s4600_s11 }
  0x30   : > { %1598 = vrot.lane.b32.xlu0 %v3476_v3, %s4601_s12  ;;  %1600 = vrot.lane.b32.xlu1 %v3477_v5, %s4601_s12 }
  0x34   : > { %1603 = vrot.lane.b32.xlu0 %v3476_v3, %s4602_s13  ;;  %1605 = vrot.lane.b32.xlu1 %v3477_v5, %s4602_s13 }
  0x38   : > { %300 = vrot.lane.b32.xlu0 %v3335_v4, %s4601_s12  ;;  %302 = vrot.lane.b32.xlu1 %v3336_v6, %s4601_s12 }
  0x3c   : > { %305 = vrot.lane.b32.xlu0 %v3335_v4, %s4602_s13  ;;  %307 = vrot.lane.b32.xlu1 %v3336_v6, %s4602_s13 }
  0x40   : > { %1608 = vrot.lane.b32.xlu0 %v3476_v3, %s4603_s14  ;;  %1610 = vrot.lane.b32.xlu1 %v3477_v5, %s4603_s14 }
  0x44   : > { %1613 = vrot.lane.b32.xlu0 %v3476_v3, %s4604_s15  ;;  %1615 = vrot.lane.b32.xlu1 %v3477_v5, %s4604_s15  ;;  %v4461_v3 = vld [vmem:[%s5762_s2 + $0xd0] sm:$0xff]  }
  0x48   : > { %310 = vrot.lane.b32.xlu0 %v3335_v4, %s4603_s14  ;;  %312 = vrot.lane.b32.xlu1 %v3336_v6, %s4603_s14 }
  0x4c   : > { %315 = vrot.lane.b32.xlu0 %v3335_v4, %s4604_s15  ;;  %317 = vrot.lane.b32.xlu1 %v3336_v6, %s4604_s15  ;;  %v3537_v6 = vcombine.high %v4864_v62, %v4864_v62 }
  0x50   : > { %1729 = vrot.lane.b32.xlu0 %v3491_v8, %s4600_s11  ;;  %1731 = vrot.lane.b32.xlu1 %v3492_v9, %s4600_s11 }
  0x54   : > { %1734 = vrot.lane.b32.xlu0 %v3491_v8, %s4601_s12  ;;  %1736 = vrot.lane.b32.xlu1 %v3492_v9, %s4601_s12 }
  0x58   : > { %1739 = vrot.lane.b32.xlu0 %v3491_v8, %s4602_s13  ;;  %1741 = vrot.lane.b32.xlu1 %v3492_v9, %s4602_s13 }
  0x5c   : > { %1744 = vrot.lane.b32.xlu0 %v3491_v8, %s4603_s14  ;;  %1746 = vrot.lane.b32.xlu1 %v3492_v9, %s4603_s14 }
  0x60   : > { %1749 = vrot.lane.b32.xlu0 %v3491_v8, %s4604_s15  ;;  %1751 = vrot.lane.b32.xlu1 %v3492_v9, %s4604_s15  ;;  %v3536_v8 = vcombine.low %v4864_v62, %v4864_v62 }
  0x64   : > { %239 = vrot.lane.b32.xlu1 %v3332_v11, %s4600_s11  ;;  %237 = vrot.lane.b32.xlu0 %v3331_v12, %s4600_s11 }
  0x68   : > { %245 = vrot.lane.b32.xlu1 %v3332_v11, %s4601_s12  ;;  %243 = vrot.lane.b32.xlu0 %v3331_v12, %s4601_s12 }
  0x6c   : > { %251 = vrot.lane.b32.xlu1 %v3332_v11, %s4602_s13  ;;  %249 = vrot.lane.b32.xlu0 %v3331_v12, %s4602_s13 }
  0x70   : > { %257 = vrot.lane.b32.xlu1 %v3332_v11, %s4603_s14  ;;  %255 = vrot.lane.b32.xlu0 %v3331_v12, %s4603_s14 }
  0x74   : > { %263 = vrot.lane.b32.xlu1 %v3332_v11, %s4604_s15  ;;  %261 = vrot.lane.b32.xlu0 %v3331_v12, %s4604_s15 }
  0x78   : > { %1867 = vrot.lane.b32.xlu1 %v3507_v14, %s4600_s11  ;;  %1865 = vrot.lane.b32.xlu0 %v3506_v15, %s4600_s11 }
  0x7c   : > { %1872 = vrot.lane.b32.xlu1 %v3507_v14, %s4601_s12  ;;  %1870 = vrot.lane.b32.xlu0 %v3506_v15, %s4601_s12 }
  0x80   : > { %1877 = vrot.lane.b32.xlu1 %v3507_v14, %s4602_s13  ;;  %1875 = vrot.lane.b32.xlu0 %v3506_v15, %s4602_s13 }
  0x84   : > { %1882 = vrot.lane.b32.xlu1 %v3507_v14, %s4603_s14  ;;  %1880 = vrot.lane.b32.xlu0 %v3506_v15, %s4603_s14 }
  0x88   : > { %1887 = vrot.lane.b32.xlu1 %v3507_v14, %s4604_s15  ;;  %1885 = vrot.lane.b32.xlu0 %v3506_v15, %s4604_s15 }
  0x8c   : > { %507 = vrot.lane.b32.xlu1 %v3357_v17, %s4600_s11  ;;  %505 = vrot.lane.b32.xlu0 %v3356_v18, %s4600_s11 }
  0x90   : > { %512 = vrot.lane.b32.xlu1 %v3357_v17, %s4601_s12  ;;  %510 = vrot.lane.b32.xlu0 %v3356_v18, %s4601_s12 }
  0x94   : > { %517 = vrot.lane.b32.xlu1 %v3357_v17, %s4602_s13  ;;  %515 = vrot.lane.b32.xlu0 %v3356_v18, %s4602_s13 }
  0x98   : > { %522 = vrot.lane.b32.xlu1 %v3357_v17, %s4603_s14  ;;  %520 = vrot.lane.b32.xlu0 %v3356_v18, %s4603_s14 }
  0x9a   : > { %v1594_v20 = vpop.permute.xlu0 %1593  ;;  %v296_v21 = vpop.permute.xlu1 %295 }
  0x9c   : > { %527 = vrot.lane.b32.xlu1 %v3357_v17, %s4604_s15  ;;  %525 = vrot.lane.b32.xlu0 %v3356_v18, %s4604_s15 }
  0x9e   : > { %v1596_v24 = vpop.permute.xlu0 %1595  ;;  %v298_v25 = vpop.permute.xlu1 %297 }
  0x9f   : > { %v1597_v26 = vsel %vm241_vm1, %v1594_v20, %v1596_v24  ;;  %v299_v27 = vsel %vm241_vm1, %v296_v21, %v298_v25 }
  0xa0   : > { %2003 = vrot.lane.b32.xlu1 %v3522_v22, %s4600_s11  ;;  %2001 = vrot.lane.b32.xlu0 %v3521_v23, %s4600_s11  ;;  %v322_v28 = vsel %vm267_vm2, %v4691_v2, %v299_v27  ;;  %v4808_v29 = vsel %vm267_vm2, %v4688_v1, %v1597_v26 }
  0xa1   : > { %3769 = vmatpush3.bf16.msra.mxu1 %v322_v28  ;;  %3949 = vmatpush3.bf16.msra.mxu0 %v4808_v29  ;;  %v4914_v28 = vld [vmem:[%s4685_s10 + $0x20] sm:$0xff] }
  0xa2   : > { %v1599_v30 = vpop.permute.xlu0 %1598  ;;  %v1601_v31 = vpop.permute.xlu1 %1600  ;;  %3950 = vmatprep.subr.bf16.mxu0 %v4599_v0  ;;  %3770 = vmatprep.subr.bf16.mxu1 %v4599_v0 }
  0xa3   : > { %v1602_v34 = vsel %vm247_vm3, %v1599_v30, %v1601_v31  ;;  %v4462_v30 = vld [vmem:[%s5762_s2 + $0xdc] sm:$0xff]  }
  0xa4   : > { %2008 = vrot.lane.b32.xlu1 %v3522_v22, %s4601_s12  ;;  %2006 = vrot.lane.b32.xlu0 %v3521_v23, %s4601_s12 }
  0xa6   : > { %v1604_v32 = vpop.permute.xlu0 %1603  ;;  %v1606_v33 = vpop.permute.xlu1 %1605 }
  0xa7   : > { %v1607_v35 = vsel %vm253_vm4, %v1604_v32, %v1606_v33 }
  0xa8   : > { %2013 = vrot.lane.b32.xlu1 %v3522_v22, %s4602_s13  ;;  %2011 = vrot.lane.b32.xlu0 %v3521_v23, %s4602_s13  ;;  %v4820_v36 = vsel %vm267_vm2, %v1602_v34, %v1607_v35  ;;  %v3387_v35 = vcombine.high %v4914_v28, %v4914_v28 }
  0xa9   : > { %3951 = vmatpush3.bf16.msra.mxu0 %v4820_v36 }
  0xaa   : > { %v301_v37 = vpop.permute.xlu0 %300  ;;  %v303_v38 = vpop.permute.xlu1 %302  ;;  %3952 = vmatprep.subr.bf16.mxu0 %v4599_v0 }
  0xab   : > { %v304_v42 = vsel %vm247_vm3, %v301_v37, %v303_v38  ;;  %v3386_v37 = vcombine.low %v4914_v28, %v4914_v28 }
  0xac   : > { %2018 = vrot.lane.b32.xlu1 %v3522_v22, %s4603_s14  ;;  %2016 = vrot.lane.b32.xlu0 %v3521_v23, %s4603_s14 }
  0xae   : > { %v306_v40 = vpop.permute.xlu0 %305  ;;  %v308_v41 = vpop.permute.xlu1 %307 }
  0xaf   : > { %v309_v43 = vsel %vm253_vm4, %v306_v40, %v308_v41 }
  0xb0   : > { %2023 = vrot.lane.b32.xlu1 %v3522_v22, %s4604_s15  ;;  %2021 = vrot.lane.b32.xlu0 %v3521_v23, %s4604_s15  ;;  %v326_v44 = vsel %vm267_vm2, %v304_v42, %v309_v43  ;;  %v4466_v22 = vld [vmem:[%s5762_s2 + $0x24] ss:$0 sps:$4 sm:$0x11]  }
  0xb1   : > { %3771 = vmatpush3.bf16.msra.mxu1 %v326_v44 }
  0xb2   : > { %v1609_v47 = vpop.permute.xlu0 %1608  ;;  %v1611_v48 = vpop.permute.xlu1 %1610  ;;  %3772 = vmatprep.subr.bf16.mxu1 %v4599_v0 }
  0xb3   : > { %v1612_v51 = vsel %vm259_vm5, %v1609_v47, %v1611_v48  ;;  %v4471_v48 = vld [vmem:[%s5762_s2 + $0xec] ss:$0 sps:$4 sm:$0x11]  }
  0xb4   : > { %643 = vrot.lane.b32.xlu1 %v3372_v45, %s4600_s11  ;;  %641 = vrot.lane.b32.xlu0 %v3371_v46, %s4600_s11 }
  0xb6   : > { %v1614_v49 = vpop.permute.xlu0 %1613  ;;  %v1616_v50 = vpop.permute.xlu1 %1615 }
  0xb7   : > { %v1617_v52 = vsel %vm265_vm6, %v1614_v49, %v1616_v50 }
  0xb8   : > { %648 = vrot.lane.b32.xlu1 %v3372_v45, %s4601_s12  ;;  %646 = vrot.lane.b32.xlu0 %v3371_v46, %s4601_s12  ;;  %v4846_v53 = vsel %vm267_vm2, %v1612_v51, %v1617_v52 }
  0xb9   : > { %3953 = vmatpush3.bf16.msra.mxu0 %v4846_v53 }
  0xba   : > { %v311_v55 = vpop.permute.xlu0 %310  ;;  %v313_v56 = vpop.permute.xlu1 %312  ;;  %3966 = vmatprep.subr.bf16.mxu0 %v4599_v0 }
  0xbb   : > { %v314_v59 = vsel %vm259_vm5, %v311_v55, %v313_v56  ;;  %v4961_v55 = vld [vmem:[%s4685_s10 + $0x78] sm:$0xff]  ;;  %v4467_v56 = vld [vmem:[%s5762_s2] sm:$0xff]  }
  0xbc   : > { %653 = vrot.lane.b32.xlu1 %v3372_v45, %s4602_s13  ;;  %651 = vrot.lane.b32.xlu0 %v3371_v46, %s4602_s13 }
  0xbd   : > { %3955 = vmatmul.mubr.msk.bf16.vlgmr.msra.gmra.mrb[0].mxu0 %vm351_vm7, %v4455_v54 }
  0xbe   : > { %v316_v57 = vpop.permute.xlu0 %315  ;;  %v318_v58 = vpop.permute.xlu1 %317  ;;  %3958 = vmatprep.mubr.msk.bf16.mxu0 %vm4605_vm0, %v4599_v0 }
  0xbf   : > { %v319_v60 = vsel %vm265_vm6, %v316_v57, %v318_v58 }
  0xc0   : > { %658 = vrot.lane.b32.xlu1 %v3372_v45, %s4603_s14  ;;  %656 = vrot.lane.b32.xlu0 %v3371_v46, %s4603_s14  ;;  %v330_v61 = vsel %vm267_vm2, %v314_v59, %v319_v60 }
  0xc1   : > { %3773 = vmatpush3.bf16.msra.mxu1 %v330_v61  ;;  %v3552_v61 = vcombine.high %v4961_v55, %v4961_v55 }
  0xc2   : > { %v1730_v1 = vpop.permute.xlu0 %1729  ;;  %v1732_v2 = vpop.permute.xlu1 %1731  ;;  %3786 = vmatprep.subr.bf16.mxu1 %v4599_v0 }
  0xc3   : > { %v1733_v4 = vsel %vm241_vm1, %v1730_v1, %v1732_v2 }
  0xc4   : > { %663 = vrot.lane.b32.xlu1 %v3372_v45, %s4604_s15  ;;  %661 = vrot.lane.b32.xlu0 %v3371_v46, %s4604_s15  ;;  %v1756_v5 = vsel %vm267_vm2, %v4724_v7, %v1733_v4  ;;  %v4465_v7 = vld [vmem:[%s5762_s2 + $0x1c] sm:$0xff]  }
  0xc5   : > { %3967 = vmatpush3.bf16.msra.mxu0 %v1756_v5  ;;  %3775 = vmatmul.mubr.msk.bf16.vlgmr.msra.gmra.mrb[0].mxu1 %vm351_vm7, %v4458_v63  ;;  %v3551_v63 = vcombine.low %v4961_v55, %v4961_v55 }
  0xc6   : > { %v1735_v9 = vpop.permute.xlu0 %1734  ;;  %v1737_v11 = vpop.permute.xlu1 %1736  ;;  %3968 = vmatprep.subr.bf16.mxu0 %v4599_v0  ;;  %3959 = vmatmul.mubr.msk.bf16.gmra.mrb[4].mxu0 %vm351_vm7, %v4461_v3 }
  0xc7   : > { %3972 = vmatprep.mubr.msk.bf16.mxu0 %vm4605_vm0, %v4599_v0  ;;  %3778 = vmatprep.mubr.msk.bf16.mxu1 %vm4605_vm0, %v4599_v0  ;;  %v1738_v15 = vsel %vm247_vm3, %v1735_v9, %v1737_v11 }
  0xc8   : > { %2139 = vrot.lane.b32.xlu1 %v3537_v6, %s4600_s11  ;;  %2137 = vrot.lane.b32.xlu0 %v3536_v8, %s4600_s11 }
  0xca   : > { %v1740_v12 = vpop.permute.xlu0 %1739  ;;  %v1742_v14 = vpop.permute.xlu1 %1741 }
  0xcb   : > { %v1743_v17 = vsel %vm253_vm4, %v1740_v12, %v1742_v14 }
  0xcc   : > { %2144 = vrot.lane.b32.xlu1 %v3537_v6, %s4601_s12  ;;  %2142 = vrot.lane.b32.xlu0 %v3536_v8, %s4601_s12  ;;  %v1760_v18 = vsel %vm267_vm2, %v1738_v15, %v1743_v17 }
  0xcd   : > { %3969 = vmatpush3.bf16.msra.mxu0 %v1760_v18  ;;  %3779 = vmatmul.mubr.msk.bf16.gmra.mrb[4].mxu1 %vm351_vm7, %v4465_v7  ;;  %v4476_v7 = vld [vmem:[%s5762_s2 + $0x10] ss:$0 sps:$4 sm:$0x11]  }
  0xce   : > { %v1745_v20 = vpop.permute.xlu0 %1744  ;;  %v1747_v21 = vpop.permute.xlu1 %1746  ;;  %3970 = vmatprep.subr.bf16.mxu0 %v4599_v0  ;;  %3782 = vmatprep.mubr.msk.bf16.mxu1 %vm4605_vm0, %v4599_v0 }
  0xcf   : > { %v1748_v25 = vsel %vm259_vm5, %v1745_v20, %v1747_v21  ;;  %v5008_v20 = vld [vmem:[%s4685_s10 + $0x28] sm:$0xff]  ;;  %v4472_v21 = vld [vmem:[%s5762_s2 + $0xf0] sm:$0xff]  }
  0xd0   : > { %2149 = vrot.lane.b32.xlu1 %v3537_v6, %s4602_s13  ;;  %2147 = vrot.lane.b32.xlu0 %v3536_v8, %s4602_s13 }
  0xd2   : > { %v1750_v23 = vpop.permute.xlu0 %1749  ;;  %v1752_v24 = vpop.permute.xlu1 %1751 }
  0xd3   : > { %v1753_v26 = vsel %vm265_vm6, %v1750_v23, %v1752_v24 }
  0xd4   : > { %2154 = vrot.lane.b32.xlu1 %v3537_v6, %s4603_s14  ;;  %2152 = vrot.lane.b32.xlu0 %v3536_v8, %s4603_s14  ;;  %v1764_v27 = vsel %vm267_vm2, %v1748_v25, %v1753_v26  ;;  %v3402_v26 = vcombine.high %v5008_v20, %v5008_v20 }
  0xd5   : > { %3971 = vmatpush3.bf16.msra.mxu0 %v1764_v27  ;;  %3783 = vmatmul.mubr.msk.bf16.gmra.mrb[8].mxu1 %vm351_vm7, %v4466_v22  ;;  %v3401_v27 = vcombine.low %v5008_v20, %v5008_v20 }
  0xd6   : > { %v240_v31 = vpop.permute.xlu1 %239  ;;  %v238_v32 = vpop.permute.xlu0 %237  ;;  %3984 = vmatprep.subr.bf16.mxu0 %v4599_v0  ;;  %3792 = vmatprep.mubr.msk.bf16.mxu1 %vm4605_vm0, %v4599_v0 }
  0xd7   : > { %v242_v33 = vsel %vm241_vm1, %v238_v32, %v240_v31 }
  0xd8   : > { %2159 = vrot.lane.b32.xlu1 %v3537_v6, %s4604_s15  ;;  %2157 = vrot.lane.b32.xlu0 %v3536_v8, %s4604_s15  ;;  %v270_v34 = vsel %vm267_vm2, %v4741_v10, %v242_v33  ;;  %v4470_v10 = vld [vmem:[%s5762_s2 + $0xe4] sm:$0xff]  }
  0xd9   : > { %3787 = vmatpush3.bf16.msra.mxu1 %v270_v34  ;;  %3973 = vmatmul.mubr.msk.bf16.vlgmr.msra.gmra.mrb[0].mxu0 %vm351_vm7, %v4462_v30 }
  0xda   : > { %v246_v38 = vpop.permute.xlu1 %245  ;;  %v244_v40 = vpop.permute.xlu0 %243  ;;  %3788 = vmatprep.subr.bf16.mxu1 %v4599_v0  ;;  %3976 = vmatprep.mubr.msk.bf16.mxu0 %vm4605_vm0, %v4599_v0 }
  0xdb   : > { %v248_v43 = vsel %vm247_vm3, %v244_v40, %v246_v38 }
  0xdc   : > { %779 = vrot.lane.b32.xlu1 %v3387_v35, %s4600_s11  ;;  %777 = vrot.lane.b32.xlu0 %v3386_v37, %s4600_s11 }
  0xde   : > { %v252_v41 = vpop.permute.xlu1 %251  ;;  %v250_v42 = vpop.permute.xlu0 %249 }
  0xdf   : > { %v254_v44 = vsel %vm253_vm4, %v250_v42, %v252_v41 }
  0xe0   : > { %784 = vrot.lane.b32.xlu1 %v3387_v35, %s4601_s12  ;;  %782 = vrot.lane.b32.xlu0 %v3386_v37, %s4601_s12  ;;  %v274_v45 = vsel %vm267_vm2, %v248_v43, %v254_v44 }
  0xe1   : > { %3789 = vmatpush3.bf16.msra.mxu1 %v274_v45  ;;  %3977 = vmatmul.mubr.msk.bf16.gmra.mrb[4].mxu0 %vm351_vm7, %v4470_v10  ;;  %v4481_v10 = vld [vmem:[%s5762_s2 + $0x100] ss:$0 sps:$4 sm:$0x11]  }
  0xe2   : > { %v258_v46 = vpop.permute.xlu1 %257  ;;  %v256_v47 = vpop.permute.xlu0 %255  ;;  %3790 = vmatprep.subr.bf16.mxu1 %v4599_v0  ;;  %3980 = vmatprep.mubr.msk.bf16.mxu0 %vm4605_vm0, %v4599_v0 }
  0xe3   : > { %v260_v51 = vsel %vm259_vm5, %v256_v47, %v258_v46  ;;  %v5055_v46 = vld [vmem:[%s4685_s10 + $0x80] sm:$0xff]  ;;  %v4477_v47 = vld [vmem:[%s5762_s2 + $0x28] sm:$0xff]  }
  0xe4   : > { %789 = vrot.lane.b32.xlu1 %v3387_v35, %s4602_s13  ;;  %787 = vrot.lane.b32.xlu0 %v3386_v37, %s4602_s13 }
  0xe6   : > { %v264_v49 = vpop.permute.xlu1 %263  ;;  %v262_v50 = vpop.permute.xlu0 %261 }
  0xe7   : > { %v266_v52 = vsel %vm265_vm6, %v262_v50, %v264_v49 }
  0xe8   : > { %794 = vrot.lane.b32.xlu1 %v3387_v35, %s4603_s14  ;;  %792 = vrot.lane.b32.xlu0 %v3386_v37, %s4603_s14  ;;  %v278_v54 = vsel %vm267_vm2, %v260_v51, %v266_v52  ;;  %v3567_v52 = vcombine.high %v5055_v46, %v5055_v46 }
  0xe9   : > { %3791 = vmatpush3.bf16.msra.mxu1 %v278_v54  ;;  %3981 = vmatmul.mubr.msk.bf16.gmra.mrb[8].mxu0 %vm351_vm7, %v4471_v48  ;;  %v3566_v54 = vcombine.low %v5055_v46, %v5055_v46 }
  0xea   : > { %v1868_v57 = vpop.permute.xlu1 %1867  ;;  %v1866_v58 = vpop.permute.xlu0 %1865  ;;  %3804 = vmatprep.subr.bf16.mxu1 %v4599_v0  ;;  %3990 = vmatprep.mubr.msk.bf16.mxu0 %vm4605_vm0, %v4599_v0 }
  0xeb   : > { %v1869_v59 = vsel %vm241_vm1, %v1866_v58, %v1868_v57 }
  0xec   : > { %799 = vrot.lane.b32.xlu1 %v3387_v35, %s4604_s15  ;;  %797 = vrot.lane.b32.xlu0 %v3386_v37, %s4604_s15  ;;  %v1892_v60 = vsel %vm267_vm2, %v4758_v13, %v1869_v59  ;;  %v4475_v13 = vld [vmem:[%s5762_s2 + $0x8] sm:$0xff]  }
  0xed   : > { %3985 = vmatpush3.bf16.msra.mxu0 %v1892_v60  ;;  %3793 = vmatmul.mubr.msk.bf16.vlgmr.msra.gmra.mrb[0].mxu1 %vm351_vm7, %v4467_v56 }
  0xee   : > { %v1873_v1 = vpop.permute.xlu1 %1872  ;;  %v1871_v2 = vpop.permute.xlu0 %1870  ;;  %3986 = vmatprep.subr.bf16.mxu0 %v4599_v0  ;;  %3796 = vmatprep.mubr.msk.bf16.mxu1 %vm4605_vm0, %v4599_v0 }
  0xef   : > { %v1874_v5 = vsel %vm247_vm3, %v1871_v2, %v1873_v1 }
  0xf0   : > { %2275 = vrot.lane.b32.xlu1 %v3552_v61, %s4600_s11  ;;  %2273 = vrot.lane.b32.xlu0 %v3551_v63, %s4600_s11 }
  0xf2   : > { %v1878_v3 = vpop.permute.xlu1 %1877  ;;  %v1876_v4 = vpop.permute.xlu0 %1875 }
  0xf3   : > { %v1879_v6 = vsel %vm253_vm4, %v1876_v4, %v1878_v3 }
  0xf4   : > { %2280 = vrot.lane.b32.xlu1 %v3552_v61, %s4601_s12  ;;  %2278 = vrot.lane.b32.xlu0 %v3551_v63, %s4601_s12  ;;  %v1896_v8 = vsel %vm267_vm2, %v1874_v5, %v1879_v6 }
  0xf5   : > { %3987 = vmatpush3.bf16.msra.mxu0 %v1896_v8  ;;  %3797 = vmatmul.mubr.msk.bf16.gmra.mrb[4].mxu1 %vm351_vm7, %v4475_v13  ;;  %v4486_v13 = vld [vmem:[%s5762_s2 + $0x38] ss:$0 sps:$4 sm:$0x11]  }
  0xf6   : > { %v1883_v9 = vpop.permute.xlu1 %1882  ;;  %v1881_v11 = vpop.permute.xlu0 %1880  ;;  %3988 = vmatprep.subr.bf16.mxu0 %v4599_v0  ;;  %3800 = vmatprep.mubr.msk.bf16.mxu1 %vm4605_vm0, %v4599_v0 }
  0xf7   : > { %v1884_v15 = vsel %vm259_vm5, %v1881_v11, %v1883_v9  ;;  %v5102_v9 = vld [vmem:[%s4685_s10 + $0x30] sm:$0xff]  ;;  %v4482_v11 = vld [vmem:[%s5762_s2 + $0x104] sm:$0xff]  }
  0xf8   : > { %2285 = vrot.lane.b32.xlu1 %v3552_v61, %s4602_s13  ;;  %2283 = vrot.lane.b32.xlu0 %v3551_v63, %s4602_s13 }
  0xfa   : > { %v1888_v12 = vpop.permute.xlu1 %1887  ;;  %v1886_v14 = vpop.permute.xlu0 %1885 }
  0xfb   : > { %v1889_v17 = vsel %vm265_vm6, %v1886_v14, %v1888_v12 }
  0xfc   : > { %2290 = vrot.lane.b32.xlu1 %v3552_v61, %s4603_s14  ;;  %2288 = vrot.lane.b32.xlu0 %v3551_v63, %s4603_s14  ;;  %v1900_v18 = vsel %vm267_vm2, %v1884_v15, %v1889_v17  ;;  %v3417_v17 = vcombine.high %v5102_v9, %v5102_v9 }
  0xfd   : > { %3989 = vmatpush3.bf16.msra.mxu0 %v1900_v18  ;;  %3801 = vmatmul.mubr.msk.bf16.gmra.mrb[8].mxu1 %vm351_vm7, %v4476_v7  ;;  %v3416_v18 = vcombine.low %v5102_v9, %v5102_v9 }
  0xfe   : > { %v508_v22 = vpop.permute.xlu1 %507  ;;  %v506_v23 = vpop.permute.xlu0 %505  ;;  %4002 = vmatprep.subr.bf16.mxu0 %v4599_v0  ;;  %3810 = vmatprep.mubr.msk.bf16.mxu1 %vm4605_vm0, %v4599_v0 }
  0xff   : > { %v509_v24 = vsel %vm241_vm1, %v506_v23, %v508_v22 }
 0x100   : > { %2295 = vrot.lane.b32.xlu1 %v3552_v61, %s4604_s15  ;;  %2293 = vrot.lane.b32.xlu0 %v3551_v63, %s4604_s15  ;;  %v532_v25 = vsel %vm267_vm2, %v4775_v16, %v509_v24  ;;  %v4480_v16 = vld [vmem:[%s5762_s2 + $0xf8] sm:$0xff]  }
 0x101   : > { %3805 = vmatpush3.bf16.msra.mxu1 %v532_v25  ;;  %3991 = vmatmul.mubr.msk.bf16.vlgmr.msra.gmra.mrb[0].mxu0 %vm351_vm7, %v4472_v21 }
 0x102   : > { %v513_v30 = vpop.permute.xlu1 %512  ;;  %v511_v31 = vpop.permute.xlu0 %510  ;;  %3806 = vmatprep.subr.bf16.mxu1 %v4599_v0  ;;  %3994 = vmatprep.mubr.msk.bf16.mxu0 %vm4605_vm0, %v4599_v0 }
 0x103   : > { %v514_v34 = vsel %vm247_vm3, %v511_v31, %v513_v30 }
 0x104   : > { %915 = vrot.lane.b32.xlu1 %v3402_v26, %s4600_s11  ;;  %913 = vrot.lane.b32.xlu0 %v3401_v27, %s4600_s11 }
 0x106   : > { %v518_v32 = vpop.permute.xlu1 %517  ;;  %v516_v33 = vpop.permute.xlu0 %515 }
 0x107   : > { %v519_v35 = vsel %vm253_vm4, %v516_v33, %v518_v32 }
 0x108   : > { %920 = vrot.lane.b32.xlu1 %v3402_v26, %s4601_s12  ;;  %918 = vrot.lane.b32.xlu0 %v3401_v27, %s4601_s12  ;;  %v536_v37 = vsel %vm267_vm2, %v514_v34, %v519_v35 }
 0x109   : > { %3807 = vmatpush3.bf16.msra.mxu1 %v536_v37  ;;  %3995 = vmatmul.mubr.msk.bf16.gmra.mrb[4].mxu0 %vm351_vm7, %v4480_v16  ;;  %v4491_v16 = vld [vmem:[%s5762_s2 + $0x114] ss:$0 sps:$4 sm:$0x11]  }
 0x10a   : > { %v523_v38 = vpop.permute.xlu1 %522  ;;  %v521_v40 = vpop.permute.xlu0 %520  ;;  %3808 = vmatprep.subr.bf16.mxu1 %v4599_v0  ;;  %3998 = vmatprep.mubr.msk.bf16.mxu0 %vm4605_vm0, %v4599_v0 }
 0x10b   : > { %v524_v43 = vsel %vm259_vm5, %v521_v40, %v523_v38  ;;  %v5149_v38 = vld [vmem:[%s4685_s10 + $0x88] sm:$0xff]  ;;  %v4487_v40 = vld [vmem:[%s5762_s2 + $0x3c] sm:$0xff]  }
 0x10c   : > { %925 = vrot.lane.b32.xlu1 %v3402_v26, %s4602_s13  ;;  %923 = vrot.lane.b32.xlu0 %v3401_v27, %s4602_s13 }
 0x10e   : > { %v528_v41 = vpop.permute.xlu1 %527  ;;  %v526_v42 = vpop.permute.xlu0 %525 }
 0x10f   : > { %v529_v44 = vsel %vm265_vm6, %v526_v42, %v528_v41 }
 0x110   : > { %930 = vrot.lane.b32.xlu1 %v3402_v26, %s4603_s14  ;;  %928 = vrot.lane.b32.xlu0 %v3401_v27, %s4603_s14  ;;  %v540_v45 = vsel %vm267_vm2, %v524_v43, %v529_v44  ;;  %v3582_v44 = vcombine.high %v5149_v38, %v5149_v38 }
 0x111   : > { %3809 = vmatpush3.bf16.msra.mxu1 %v540_v45  ;;  %3999 = vmatmul.mubr.msk.bf16.gmra.mrb[8].mxu0 %vm351_vm7, %v4481_v10  ;;  %v3581_v45 = vcombine.low %v5149_v38, %v5149_v38 }
 0x112   : > { %v2004_v48 = vpop.permute.xlu1 %2003  ;;  %v2002_v49 = vpop.permute.xlu0 %2001  ;;  %3822 = vmatprep.subr.bf16.mxu1 %v4599_v0  ;;  %4008 = vmatprep.mubr.msk.bf16.mxu0 %vm4605_vm0, %v4599_v0 }
 0x113   : > { %v2005_v50 = vsel %vm241_vm1, %v2002_v49, %v2004_v48 }
 0x114   : > { %935 = vrot.lane.b32.xlu1 %v3402_v26, %s4604_s15  ;;  %933 = vrot.lane.b32.xlu0 %v3401_v27, %s4604_s15  ;;  %v2028_v51 = vsel %vm267_vm2, %v4792_v19, %v2005_v50  ;;  %v4485_v19 = vld [vmem:[%s5762_s2 + $0x30] sm:$0xff]  }
 0x115   : > { %4003 = vmatpush3.bf16.msra.mxu0 %v2028_v51  ;;  %3811 = vmatmul.mubr.msk.bf16.vlgmr.msra.gmra.mrb[0].mxu1 %vm351_vm7, %v4477_v47 }
 0x116   : > { %v2009_v56 = vpop.permute.xlu1 %2008  ;;  %v2007_v57 = vpop.permute.xlu0 %2006  ;;  %4004 = vmatprep.subr.bf16.mxu0 %v4599_v0  ;;  %3814 = vmatprep.mubr.msk.bf16.mxu1 %vm4605_vm0, %v4599_v0 }
 0x117   : > { %v2010_v60 = vsel %vm247_vm3, %v2007_v57, %v2009_v56 }
 0x118   : > { %2411 = vrot.lane.b32.xlu1 %v3567_v52, %s4600_s11  ;;  %2409 = vrot.lane.b32.xlu0 %v3566_v54, %s4600_s11 }
 0x11a   : > { %v2014_v58 = vpop.permute.xlu1 %2013  ;;  %v2012_v59 = vpop.permute.xlu0 %2011 }
 0x11b   : > { %v2015_v61 = vsel %vm253_vm4, %v2012_v59, %v2014_v58 }
 0x11c   : > { %2416 = vrot.lane.b32.xlu1 %v3567_v52, %s4601_s12  ;;  %2414 = vrot.lane.b32.xlu0 %v3566_v54, %s4601_s12  ;;  %v2032_v63 = vsel %vm267_vm2, %v2010_v60, %v2015_v61 }
 0x11d   : > { %4005 = vmatpush3.bf16.msra.mxu0 %v2032_v63  ;;  %3815 = vmatmul.mubr.msk.bf16.gmra.mrb[4].mxu1 %vm351_vm7, %v4485_v19  ;;  %v4496_v19 = vld [vmem:[%s5762_s2 + $0x4c] ss:$0 sps:$4 sm:$0x11]  }
 0x11e   : > { %v2019_v1 = vpop.permute.xlu1 %2018  ;;  %v2017_v2 = vpop.permute.xlu0 %2016  ;;  %4006 = vmatprep.subr.bf16.mxu0 %v4599_v0  ;;  %3818 = vmatprep.mubr.msk.bf16.mxu1 %vm4605_vm0, %v4599_v0 }
 0x11f   : > { %v2020_v5 = vsel %vm259_vm5, %v2017_v2, %v2019_v1  ;;  %v5196_v1 = vld [vmem:[%s4685_s10 + $0x38] sm:$0xff] }
 0x120   : > { %2421 = vrot.lane.b32.xlu1 %v3567_v52, %s4602_s13  ;;  %2419 = vrot.lane.b32.xlu0 %v3566_v54, %s4602_s13  ;;  %v4492_v2 = vld [vmem:[%s5762_s2 + $0x118] sm:$0xff]  }
 0x122   : > { %v2024_v3 = vpop.permute.xlu1 %2023  ;;  %v2022_v4 = vpop.permute.xlu0 %2021 }
 0x123   : > { %v2025_v6 = vsel %vm265_vm6, %v2022_v4, %v2024_v3 }
 0x124   : > { %2426 = vrot.lane.b32.xlu1 %v3567_v52, %s4603_s14  ;;  %2424 = vrot.lane.b32.xlu0 %v3566_v54, %s4603_s14  ;;  %v2036_v8 = vsel %vm267_vm2, %v2020_v5, %v2025_v6  ;;  %v3432_v6 = vcombine.high %v5196_v1, %v5196_v1 }
 0x125   : > { %4007 = vmatpush3.bf16.msra.mxu0 %v2036_v8  ;;  %3819 = vmatmul.mubr.msk.bf16.gmra.mrb[8].mxu1 %vm351_vm7, %v4486_v13  ;;  %v3431_v8 = vcombine.low %v5196_v1, %v5196_v1 }
 0x126   : > { %v644_v7 = vpop.permute.xlu1 %643  ;;  %v642_v12 = vpop.permute.xlu0 %641  ;;  %4020 = vmatprep.subr.bf16.mxu0 %v4599_v0  ;;  %3828 = vmatprep.mubr.msk.bf16.mxu1 %vm4605_vm0, %v4599_v0 }
 0x127   : > { %v645_v14 = vsel %vm241_vm1, %v642_v12, %v644_v7 }
 0x128   : > { %2431 = vrot.lane.b32.xlu1 %v3567_v52, %s4604_s15  ;;  %2429 = vrot.lane.b32.xlu0 %v3566_v54, %s4604_s15  ;;  %v668_v15 = vsel %vm267_vm2, %v4827_v39, %v645_v14  ;;  %v4490_v39 = vld [vmem:[%s5762_s2 + $0x10c] sm:$0xff]  }
 0x129   : > { %3823 = vmatpush3.bf16.msra.mxu1 %v668_v15  ;;  %4009 = vmatmul.mubr.msk.bf16.vlgmr.msra.gmra.mrb[0].mxu0 %vm351_vm7, %v4482_v11 }
 0x12a   : > { %v649_v21 = vpop.permute.xlu1 %648  ;;  %v647_v22 = vpop.permute.xlu0 %646  ;;  %3824 = vmatprep.subr.bf16.mxu1 %v4599_v0  ;;  %4012 = vmatprep.mubr.msk.bf16.mxu0 %vm4605_vm0, %v4599_v0 }
 0x12b   : > { %v650_v25 = vsel %vm247_vm3, %v647_v22, %v649_v21 }
 0x12c   : > { %1051 = vrot.lane.b32.xlu1 %v3417_v17, %s4600_s11  ;;  %1049 = vrot.lane.b32.xlu0 %v3416_v18, %s4600_s11 }
 0x12e   : > { %v654_v23 = vpop.permute.xlu1 %653  ;;  %v652_v24 = vpop.permute.xlu0 %651 }
 0x12f   : > { %v655_v26 = vsel %vm253_vm4, %v652_v24, %v654_v23 }
 0x130   : > { %1056 = vrot.lane.b32.xlu1 %v3417_v17, %s4601_s12  ;;  %1054 = vrot.lane.b32.xlu0 %v3416_v18, %s4601_s12  ;;  %v672_v27 = vsel %vm267_vm2, %v650_v25, %v655_v26 }
 0x131   : > { %3825 = vmatpush3.bf16.msra.mxu1 %v672_v27  ;;  %4013 = vmatmul.mubr.msk.bf16.gmra.mrb[4].mxu0 %vm351_vm7, %v4490_v39  ;;  %v4501_v39 = vld [vmem:[%s5762_s2 + $0x128] ss:$0 sps:$4 sm:$0x11]  }
 0x132   : > { %v659_v30 = vpop.permute.xlu1 %658  ;;  %v657_v31 = vpop.permute.xlu0 %656  ;;  %3826 = vmatprep.subr.bf16.mxu1 %v4599_v0  ;;  %4016 = vmatprep.mubr.msk.bf16.mxu0 %vm4605_vm0, %v4599_v0 }
 0x133   : > { %v660_v34 = vsel %vm259_vm5, %v657_v31, %v659_v30  ;;  %v5243_v30 = vld [vmem:[%s4685_s10 + $0x90] sm:$0xff] }
 0x134   : > { %1061 = vrot.lane.b32.xlu1 %v3417_v17, %s4602_s13  ;;  %1059 = vrot.lane.b32.xlu0 %v3416_v18, %s4602_s13  ;;  %v4497_v31 = vld [vmem:[%s5762_s2 + $0x50] sm:$0xff]  }
 0x136   : > { %v664_v32 = vpop.permute.xlu1 %663  ;;  %v662_v33 = vpop.permute.xlu0 %661 }
 0x137   : > { %v665_v35 = vsel %vm265_vm6, %v662_v33, %v664_v32 }
 0x138   : > { %1066 = vrot.lane.b32.xlu1 %v3417_v17, %s4603_s14  ;;  %1064 = vrot.lane.b32.xlu0 %v3416_v18, %s4603_s14  ;;  %v676_v37 = vsel %vm267_vm2, %v660_v34, %v665_v35  ;;  %v3597_v35 = vcombine.high %v5243_v30, %v5243_v30 }
 0x139   : > { %3827 = vmatpush3.bf16.msra.mxu1 %v676_v37  ;;  %4017 = vmatmul.mubr.msk.bf16.gmra.mrb[8].mxu0 %vm351_vm7, %v4491_v16  ;;  %v3596_v37 = vcombine.low %v5243_v30, %v5243_v30 }
 0x13a   : > { %v2140_v10 = vpop.permute.xlu1 %2139  ;;  %v2138_v41 = vpop.permute.xlu0 %2137  ;;  %3840 = vmatprep.subr.bf16.mxu1 %v4599_v0  ;;  %4026 = vmatprep.mubr.msk.bf16.mxu0 %vm4605_vm0, %v4599_v0 }
 0x13b   : > { %v2141_v42 = vsel %vm241_vm1, %v2138_v41, %v2140_v10 }
 0x13c   : > { %1071 = vrot.lane.b32.xlu1 %v3417_v17, %s4604_s15  ;;  %1069 = vrot.lane.b32.xlu0 %v3416_v18, %s4604_s15  ;;  %v2164_v43 = vsel %vm267_vm2, %v4864_v62, %v2141_v42  ;;  %v4495_v62 = vld [vmem:[%s5762_s2 + $0x44] sm:$0xff]  }
 0x13d   : > { %4021 = vmatpush3.bf16.msra.mxu0 %v2164_v43  ;;  %3829 = vmatmul.mubr.msk.bf16.vlgmr.msra.gmra.mrb[0].mxu1 %vm351_vm7, %v4487_v40 }
 0x13e   : > { %v2145_v47 = vpop.permute.xlu1 %2144  ;;  %v2143_v48 = vpop.permute.xlu0 %2142  ;;  %4022 = vmatprep.subr.bf16.mxu0 %v4599_v0  ;;  %3832 = vmatprep.mubr.msk.bf16.mxu1 %vm4605_vm0, %v4599_v0 }
 0x13f   : > { %v2146_v51 = vsel %vm247_vm3, %v2143_v48, %v2145_v47 }
 0x140   : > { %2547 = vrot.lane.b32.xlu1 %v3582_v44, %s4600_s11  ;;  %2545 = vrot.lane.b32.xlu0 %v3581_v45, %s4600_s11 }
 0x142   : > { %v2150_v49 = vpop.permute.xlu1 %2149  ;;  %v2148_v50 = vpop.permute.xlu0 %2147 }
 0x143   : > { %v2151_v52 = vsel %vm253_vm4, %v2148_v50, %v2150_v49 }
 0x144   : > { %2552 = vrot.lane.b32.xlu1 %v3582_v44, %s4601_s12  ;;  %2550 = vrot.lane.b32.xlu0 %v3581_v45, %s4601_s12  ;;  %v2168_v54 = vsel %vm267_vm2, %v2146_v51, %v2151_v52 }
 0x145   : > { %4023 = vmatpush3.bf16.msra.mxu0 %v2168_v54  ;;  %3833 = vmatmul.mubr.msk.bf16.gmra.mrb[4].mxu1 %vm351_vm7, %v4495_v62  ;;  %v4506_v62 = vld [vmem:[%s5762_s2 + $0x60] ss:$0 sps:$4 sm:$0x11]  }
 0x146   : > { %v2155_v56 = vpop.permute.xlu1 %2154  ;;  %v2153_v57 = vpop.permute.xlu0 %2152  ;;  %4024 = vmatprep.subr.bf16.mxu0 %v4599_v0  ;;  %3836 = vmatprep.mubr.msk.bf16.mxu1 %vm4605_vm0, %v4599_v0 }
 0x147   : > { %v2156_v60 = vsel %vm259_vm5, %v2153_v57, %v2155_v56  ;;  %v5290_v56 = vld [vmem:[%s4685_s10 + $0x40] sm:$0xff]  ;;  %v4502_v57 = vld [vmem:[%s5762_s2 + $0x12c] sm:$0xff]  }
 0x148   : > { %2557 = vrot.lane.b32.xlu1 %v3582_v44, %s4602_s13  ;;  %2555 = vrot.lane.b32.xlu0 %v3581_v45, %s4602_s13 }
 0x14a   : > { %v2160_v58 = vpop.permute.xlu1 %2159  ;;  %v2158_v59 = vpop.permute.xlu0 %2157 }
 0x14b   : > { %v2161_v61 = vsel %vm265_vm6, %v2158_v59, %v2160_v58 }
 0x14c   : > { %2562 = vrot.lane.b32.xlu1 %v3582_v44, %s4603_s14  ;;  %2560 = vrot.lane.b32.xlu0 %v3581_v45, %s4603_s14  ;;  %v2172_v63 = vsel %vm267_vm2, %v2156_v60, %v2161_v61  ;;  %v3447_v61 = vcombine.high %v5290_v56, %v5290_v56 }
 0x14d   : > { %4025 = vmatpush3.bf16.msra.mxu0 %v2172_v63  ;;  %3837 = vmatmul.mubr.msk.bf16.gmra.mrb[8].mxu1 %vm351_vm7, %v4496_v19  ;;  %v3446_v63 = vcombine.low %v5290_v56, %v5290_v56 }
 0x14e   : > { %v780_v13 = vpop.permute.xlu1 %779  ;;  %v778_v3 = vpop.permute.xlu0 %777  ;;  %4038 = vmatprep.subr.bf16.mxu0 %v4599_v0  ;;  %3846 = vmatprep.mubr.msk.bf16.mxu1 %vm4605_vm0, %v4599_v0 }
 0x14f   : > { %v781_v4 = vsel %vm241_vm1, %v778_v3, %v780_v13 }
 0x150   : > { %2567 = vrot.lane.b32.xlu1 %v3582_v44, %s4604_s15  ;;  %2565 = vrot.lane.b32.xlu0 %v3581_v45, %s4604_s15  ;;  %v804_v5 = vsel %vm267_vm2, %v4914_v28, %v781_v4  ;;  %v4500_v28 = vld [vmem:[%s5762_s2 + $0x120] sm:$0xff]  }
 0x151   : > { %3841 = vmatpush3.bf16.msra.mxu1 %v804_v5  ;;  %4027 = vmatmul.mubr.msk.bf16.vlgmr.msra.gmra.mrb[0].mxu0 %vm351_vm7, %v4492_v2 }
 0x152   : > { %v785_v11 = vpop.permute.xlu1 %784  ;;  %v783_v7 = vpop.permute.xlu0 %782  ;;  %3842 = vmatprep.subr.bf16.mxu1 %v4599_v0  ;;  %4030 = vmatprep.mubr.msk.bf16.mxu0 %vm4605_vm0, %v4599_v0 }
 0x153   : > { %v786_v15 = vsel %vm247_vm3, %v783_v7, %v785_v11 }
 0x154   : > { %1187 = vrot.lane.b32.xlu1 %v3432_v6, %s4600_s11  ;;  %1185 = vrot.lane.b32.xlu0 %v3431_v8, %s4600_s11 }
 0x156   : > { %v790_v12 = vpop.permute.xlu1 %789  ;;  %v788_v14 = vpop.permute.xlu0 %787 }
 0x157   : > { %v791_v17 = vsel %vm253_vm4, %v788_v14, %v790_v12 }
 0x158   : > { %1192 = vrot.lane.b32.xlu1 %v3432_v6, %s4601_s12  ;;  %1190 = vrot.lane.b32.xlu0 %v3431_v8, %s4601_s12  ;;  %v808_v18 = vsel %vm267_vm2, %v786_v15, %v791_v17 }
 0x159   : > { %3843 = vmatpush3.bf16.msra.mxu1 %v808_v18  ;;  %4031 = vmatmul.mubr.msk.bf16.gmra.mrb[4].mxu0 %vm351_vm7, %v4500_v28  ;;  %v4511_v28 = vld [vmem:[%s5762_s2 + $0x13c] ss:$0 sps:$4 sm:$0x11]  }
 0x15a   : > { %v795_v21 = vpop.permute.xlu1 %794  ;;  %v793_v22 = vpop.permute.xlu0 %792  ;;  %3844 = vmatprep.subr.bf16.mxu1 %v4599_v0  ;;  %4034 = vmatprep.mubr.msk.bf16.mxu0 %vm4605_vm0, %v4599_v0 }
 0x15b   : > { %v796_v25 = vsel %vm259_vm5, %v793_v22, %v795_v21  ;;  %v5337_v21 = vld [vmem:[%s4685_s10 + $0x98] sm:$0xff]  ;;  %v4507_v22 = vld [vmem:[%s5762_s2 + $0x64] sm:$0xff]  }
 0x15c   : > { %1197 = vrot.lane.b32.xlu1 %v3432_v6, %s4602_s13  ;;  %1195 = vrot.lane.b32.xlu0 %v3431_v8, %s4602_s13 }
 0x15e   : > { %v800_v23 = vpop.permute.xlu1 %799  ;;  %v798_v24 = vpop.permute.xlu0 %797 }
 0x15f   : > { %v801_v26 = vsel %vm265_vm6, %v798_v24, %v800_v23 }
 0x160   : > { %1202 = vrot.lane.b32.xlu1 %v3432_v6, %s4603_s14  ;;  %1200 = vrot.lane.b32.xlu0 %v3431_v8, %s4603_s14  ;;  %v812_v27 = vsel %vm267_vm2, %v796_v25, %v801_v26  ;;  %v3612_v26 = vcombine.high %v5337_v21, %v5337_v21 }
 0x161   : > { %3845 = vmatpush3.bf16.msra.mxu1 %v812_v27  ;;  %4035 = vmatmul.mubr.msk.bf16.gmra.mrb[8].mxu0 %vm351_vm7, %v4501_v39  ;;  %v3611_v27 = vcombine.low %v5337_v21, %v5337_v21 }
 0x162   : > { %v2276_v16 = vpop.permute.xlu1 %2275  ;;  %v2274_v32 = vpop.permute.xlu0 %2273  ;;  %3858 = vmatprep.subr.bf16.mxu1 %v4599_v0  ;;  %4044 = vmatprep.mubr.msk.bf16.mxu0 %vm4605_vm0, %v4599_v0 }
 0x163   : > { %v2277_v33 = vsel %vm241_vm1, %v2274_v32, %v2276_v16 }
 0x164   : > { %1207 = vrot.lane.b32.xlu1 %v3432_v6, %s4604_s15  ;;  %1205 = vrot.lane.b32.xlu0 %v3431_v8, %s4604_s15  ;;  %v2300_v34 = vsel %vm267_vm2, %v4961_v55, %v2277_v33  ;;  %v4505_v55 = vld [vmem:[%s5762_s2 + $0x58] sm:$0xff]  }
 0x165   : > { %4039 = vmatpush3.bf16.msra.mxu0 %v2300_v34  ;;  %3847 = vmatmul.mubr.msk.bf16.vlgmr.msra.gmra.mrb[0].mxu1 %vm351_vm7, %v4497_v31 }
 0x166   : > { %v2281_v40 = vpop.permute.xlu1 %2280  ;;  %v2279_v10 = vpop.permute.xlu0 %2278  ;;  %4040 = vmatprep.subr.bf16.mxu0 %v4599_v0  ;;  %3850 = vmatprep.mubr.msk.bf16.mxu1 %vm4605_vm0, %v4599_v0 }
 0x167   : > { %v2282_v43 = vsel %vm247_vm3, %v2279_v10, %v2281_v40 }
 0x168   : > { %2683 = vrot.lane.b32.xlu1 %v3597_v35, %s4600_s11  ;;  %2681 = vrot.lane.b32.xlu0 %v3596_v37, %s4600_s11 }
 0x16a   : > { %v2286_v41 = vpop.permute.xlu1 %2285  ;;  %v2284_v42 = vpop.permute.xlu0 %2283 }
 0x16b   : > { %v2287_v44 = vsel %vm253_vm4, %v2284_v42, %v2286_v41 }
 0x16c   : > { %2688 = vrot.lane.b32.xlu1 %v3597_v35, %s4601_s12  ;;  %2686 = vrot.lane.b32.xlu0 %v3596_v37, %s4601_s12  ;;  %v2304_v45 = vsel %vm267_vm2, %v2282_v43, %v2287_v44 }
 0x16d   : > { %4041 = vmatpush3.bf16.msra.mxu0 %v2304_v45  ;;  %3851 = vmatmul.mubr.msk.bf16.gmra.mrb[4].mxu1 %vm351_vm7, %v4505_v55  ;;  %v4516_v55 = vld [vmem:[%s5762_s2 + $0x74] ss:$0 sps:$4 sm:$0x11]  }
 0x16e   : > { %v2291_v47 = vpop.permute.xlu1 %2290  ;;  %v2289_v48 = vpop.permute.xlu0 %2288  ;;  %4042 = vmatprep.subr.bf16.mxu0 %v4599_v0  ;;  %3854 = vmatprep.mubr.msk.bf16.mxu1 %vm4605_vm0, %v4599_v0 }
 0x16f   : > { %v2292_v51 = vsel %vm259_vm5, %v2289_v48, %v2291_v47  ;;  %v5384_v47 = vld [vmem:[%s4685_s10 + $0x48] sm:$0xff]  ;;  %v4512_v48 = vld [vmem:[%s5762_s2 + $0x140] sm:$0xff]  }
 0x170   : > { %2693 = vrot.lane.b32.xlu1 %v3597_v35, %s4602_s13  ;;  %2691 = vrot.lane.b32.xlu0 %v3596_v37, %s4602_s13 }
 0x172   : > { %v2296_v49 = vpop.permute.xlu1 %2295  ;;  %v2294_v50 = vpop.permute.xlu0 %2293 }
 0x173   : > { %v2297_v52 = vsel %vm265_vm6, %v2294_v50, %v2296_v49 }
 0x174   : > { %2698 = vrot.lane.b32.xlu1 %v3597_v35, %s4603_s14  ;;  %2696 = vrot.lane.b32.xlu0 %v3596_v37, %s4603_s14  ;;  %v2308_v54 = vsel %vm267_vm2, %v2292_v51, %v2297_v52  ;;  %v3462_v52 = vcombine.high %v5384_v47, %v5384_v47 }
 0x175   : > { %4043 = vmatpush3.bf16.msra.mxu0 %v2308_v54  ;;  %3855 = vmatmul.mubr.msk.bf16.gmra.mrb[8].mxu1 %vm351_vm7, %v4506_v62  ;;  %v3461_v54 = vcombine.low %v5384_v47, %v5384_v47 }
 0x176   : > { %v916_v19 = vpop.permute.xlu1 %915  ;;  %v914_v58 = vpop.permute.xlu0 %913  ;;  %4056 = vmatprep.subr.bf16.mxu0 %v4599_v0  ;;  %3864 = vmatprep.mubr.msk.bf16.mxu1 %vm4605_vm0, %v4599_v0 }
 0x177   : > { %v917_v59 = vsel %vm241_vm1, %v914_v58, %v916_v19 }
 0x178   : > { %2703 = vrot.lane.b32.xlu1 %v3597_v35, %s4604_s15  ;;  %2701 = vrot.lane.b32.xlu0 %v3596_v37, %s4604_s15  ;;  %v940_v60 = vsel %vm267_vm2, %v5008_v20, %v917_v59  ;;  %v4510_v20 = vld [vmem:[%s5762_s2 + $0x134] sm:$0xff]  }
 0x179   : > { %3859 = vmatpush3.bf16.msra.mxu1 %v940_v60  ;;  %4045 = vmatmul.mubr.msk.bf16.vlgmr.msra.gmra.mrb[0].mxu0 %vm351_vm7, %v4502_v57 }
 0x17a   : > { %v921_v2 = vpop.permute.xlu1 %920  ;;  %v919_v13 = vpop.permute.xlu0 %918  ;;  %3860 = vmatprep.subr.bf16.mxu1 %v4599_v0  ;;  %4048 = vmatprep.mubr.msk.bf16.mxu0 %vm4605_vm0, %v4599_v0 }
 0x17b   : > { %v922_v5 = vsel %vm247_vm3, %v919_v13, %v921_v2 }
 0x17c   : > { %1323 = vrot.lane.b32.xlu1 %v3447_v61, %s4600_s11  ;;  %1321 = vrot.lane.b32.xlu0 %v3446_v63, %s4600_s11 }
 0x17e   : > { %v926_v3 = vpop.permute.xlu1 %925  ;;  %v924_v4 = vpop.permute.xlu0 %923 }
 0x17f   : > { %v927_v6 = vsel %vm253_vm4, %v924_v4, %v926_v3 }
 0x180   : > { %1328 = vrot.lane.b32.xlu1 %v3447_v61, %s4601_s12  ;;  %1326 = vrot.lane.b32.xlu0 %v3446_v63, %s4601_s12  ;;  %v944_v8 = vsel %vm267_vm2, %v922_v5, %v927_v6 }
 0x181   : > { %3861 = vmatpush3.bf16.msra.mxu1 %v944_v8  ;;  %4049 = vmatmul.mubr.msk.bf16.gmra.mrb[4].mxu0 %vm351_vm7, %v4510_v20  ;;  %v4519_v20 = vld [vmem:[%s5762_s2 + $0x150] ss:$0 sps:$4 sm:$0x11]  }
 0x182   : > { %v931_v11 = vpop.permute.xlu1 %930  ;;  %v929_v7 = vpop.permute.xlu0 %928  ;;  %3862 = vmatprep.subr.bf16.mxu1 %v4599_v0  ;;  %4052 = vmatprep.mubr.msk.bf16.mxu0 %vm4605_vm0, %v4599_v0 }
 0x183   : > { %v932_v15 = vsel %vm259_vm5, %v929_v7, %v931_v11  ;;  %v5431_v11 = vld [vmem:[%s4685_s10 + $0xa0] sm:$0xff]  ;;  %v4517_v7 = vld [vmem:[%s5762_s2 + $0x78] sm:$0xff]   ;;  %s3328_s10 = sshll.u32 %s224_s21, 3 }
 0x184   : > { %1333 = vrot.lane.b32.xlu1 %v3447_v61, %s4602_s13  ;;  %1331 = vrot.lane.b32.xlu0 %v3446_v63, %s4602_s13  ;;  %s5728_s29 = scalar_lea.vmem %s5765_s5, %s3328_s10 }
 0x186   : > { %v936_v12 = vpop.permute.xlu1 %935  ;;  %v934_v14 = vpop.permute.xlu0 %933 }
 0x187   : > { %v937_v17 = vsel %vm265_vm6, %v934_v14, %v936_v12 }
 0x188   : > { %1338 = vrot.lane.b32.xlu1 %v3447_v61, %s4603_s14  ;;  %1336 = vrot.lane.b32.xlu0 %v3446_v63, %s4603_s14  ;;  %v948_v18 = vsel %vm267_vm2, %v932_v15, %v937_v17  ;;  %v3627_v17 = vcombine.high %v5431_v11, %v5431_v11 }
 0x189   : > { %3863 = vmatpush3.bf16.msra.mxu1 %v948_v18  ;;  %4053 = vmatmul.mubr.msk.bf16.gmra.mrb[8].mxu0 %vm351_vm7, %v4511_v28  ;;  %v3626_v18 = vcombine.low %v5431_v11, %v5431_v11 }
 0x18a   : > { %v2412_v39 = vpop.permute.xlu1 %2411  ;;  %v2410_v23 = vpop.permute.xlu0 %2409  ;;  %3876 = vmatprep.subr.bf16.mxu1 %v4599_v0  ;;  %4062 = vmatprep.mubr.msk.bf16.mxu0 %vm4605_vm0, %v4599_v0 }
 0x18b   : > { %v2413_v24 = vsel %vm241_vm1, %v2410_v23, %v2412_v39 }
 0x18c   : > { %1343 = vrot.lane.b32.xlu1 %v3447_v61, %s4604_s15  ;;  %1341 = vrot.lane.b32.xlu0 %v3446_v63, %s4604_s15  ;;  %v2436_v25 = vsel %vm267_vm2, %v5055_v46, %v2413_v24  ;;  %v4515_v46 = vld [vmem:[%s5762_s2 + $0x6c] sm:$0xff]  }
 0x18d   : > { %4057 = vmatpush3.bf16.msra.mxu0 %v2436_v25  ;;  %3865 = vmatmul.mubr.msk.bf16.vlgmr.msra.gmra.mrb[0].mxu1 %vm351_vm7, %v4507_v22 }
 0x18e   : > { %v2417_v31 = vpop.permute.xlu1 %2416  ;;  %v2415_v16 = vpop.permute.xlu0 %2414  ;;  %4058 = vmatprep.subr.bf16.mxu0 %v4599_v0  ;;  %3868 = vmatprep.mubr.msk.bf16.mxu1 %vm4605_vm0, %v4599_v0 }
 0x18f   : > { %v2418_v34 = vsel %vm247_vm3, %v2415_v16, %v2417_v31 }
 0x190   : > { %2819 = vrot.lane.b32.xlu1 %v3612_v26, %s4600_s11  ;;  %2817 = vrot.lane.b32.xlu0 %v3611_v27, %s4600_s11 }
 0x192   : > { %v2422_v32 = vpop.permute.xlu1 %2421  ;;  %v2420_v33 = vpop.permute.xlu0 %2419 }
 0x193   : > { %v2423_v35 = vsel %vm253_vm4, %v2420_v33, %v2422_v32 }
 0x194   : > { %2824 = vrot.lane.b32.xlu1 %v3612_v26, %s4601_s12  ;;  %2822 = vrot.lane.b32.xlu0 %v3611_v27, %s4601_s12  ;;  %v2440_v37 = vsel %vm267_vm2, %v2418_v34, %v2423_v35 }
 0x195   : > { %4059 = vmatpush3.bf16.msra.mxu0 %v2440_v37  ;;  %3869 = vmatmul.mubr.msk.bf16.gmra.mrb[4].mxu1 %vm351_vm7, %v4515_v46  ;;  %v4522_v46 = vld [vmem:[%s5762_s2 + $0x88] ss:$0 sps:$4 sm:$0x11]  }
 0x196   : > { %v2427_v40 = vpop.permute.xlu1 %2426  ;;  %v2425_v10 = vpop.permute.xlu0 %2424  ;;  %4060 = vmatprep.subr.bf16.mxu0 %v4599_v0  ;;  %3872 = vmatprep.mubr.msk.bf16.mxu1 %vm4605_vm0, %v4599_v0 }
 0x197   : > { %v2428_v43 = vsel %vm259_vm5, %v2425_v10, %v2427_v40  ;;  %v4520_v40 = vld [vmem:[%s5762_s2 + $0x154] sm:$0xff]  }
 0x198   : > { %2829 = vrot.lane.b32.xlu1 %v3612_v26, %s4602_s13  ;;  %2827 = vrot.lane.b32.xlu0 %v3611_v27, %s4602_s13 }
 0x19a   : > { %v2432_v41 = vpop.permute.xlu1 %2431  ;;  %v2430_v42 = vpop.permute.xlu0 %2429 }
 0x19b   : > { %v2433_v44 = vsel %vm265_vm6, %v2430_v42, %v2432_v41 }
 0x19c   : > { %2834 = vrot.lane.b32.xlu1 %v3612_v26, %s4603_s14  ;;  %2832 = vrot.lane.b32.xlu0 %v3611_v27, %s4603_s14  ;;  %v2444_v45 = vsel %vm267_vm2, %v2428_v43, %v2433_v44 }
 0x19d   : > { %4061 = vmatpush3.bf16.msra.mxu0 %v2444_v45  ;;  %3873 = vmatmul.mubr.msk.bf16.gmra.mrb[8].mxu1 %vm351_vm7, %v4516_v55  ;;  %v4524_v45 = vld [vmem:[%s5762_s2 + $0x15c] sm:$0xff]  }
 0x19e   : > { %v1052_v62 = vpop.permute.xlu1 %1051  ;;  %v1050_v49 = vpop.permute.xlu0 %1049  ;;  %4074 = vmatprep.subr.bf16.mxu0 %v4599_v0  ;;  %3882 = vmatprep.mubr.msk.bf16.mxu1 %vm4605_vm0, %v4599_v0 }
 0x19f   : > { %v1053_v50 = vsel %vm241_vm1, %v1050_v49, %v1052_v62 }
 0x1a0   : > { %2839 = vrot.lane.b32.xlu1 %v3612_v26, %s4604_s15  ;;  %2837 = vrot.lane.b32.xlu0 %v3611_v27, %s4604_s15  ;;  %v1076_v51 = vsel %vm267_vm2, %v5102_v9, %v1053_v50  ;;  %v4518_v9 = vld [vmem:[%s5762_s2 + $0x148] sm:$0xff]  }
 0x1a1   : > { %3877 = vmatpush3.bf16.msra.mxu1 %v1076_v51  ;;  %4063 = vmatmul.mubr.msk.bf16.vlgmr.msra.gmra.mrb[0].mxu0 %vm351_vm7, %v4512_v48  ;;  %v3080_v51 = vld [vmem:[%s5763_s3 + $0x8] sm:$0xff] }
 0x1a2   : > { %v1057_v57 = vpop.permute.xlu1 %1056  ;;  %v1055_v19 = vpop.permute.xlu0 %1054  ;;  %3878 = vmatprep.subr.bf16.mxu1 %v4599_v0  ;;  %4066 = vmatprep.mubr.msk.bf16.mxu0 %vm4605_vm0, %v4599_v0 }
 0x1a3   : > { %v1058_v60 = vsel %vm247_vm3, %v1055_v19, %v1057_v57  ;;  %v4606_v19 = vmov 0  }
 0x1a4   : > { %1459 = vrot.lane.b32.xlu1 %v3462_v52, %s4600_s11  ;;  %1457 = vrot.lane.b32.xlu0 %v3461_v54, %s4600_s11 }
 0x1a5   : > { %4438 = vset.pattern.permute.xlu1 %v4606_v19  ;;  %4437 = vset.pattern.permute.xlu0 %v4606_v19  ;;  %v4529_v19 = vld [vmem:[%s5762_s2 + $0xa0] sm:$0xff]  }
 0x1a6   : > { %v1062_v58 = vpop.permute.xlu1 %1061  ;;  %v1060_v59 = vpop.permute.xlu0 %1059 }
 0x1a7   : > { %v1063_v61 = vsel %vm253_vm4, %v1060_v59, %v1062_v58  ;;  %v3081_v58 = vld [vmem:[%s5763_s3 + $0x10] sm:$0xff]  ;;  %v3082_v59 = vld [vmem:[%s5763_s3 + $0x18] sm:$0xff] }
 0x1a8   : > { %1464 = vrot.lane.b32.xlu1 %v3462_v52, %s4601_s12  ;;  %1462 = vrot.lane.b32.xlu0 %v3461_v54, %s4601_s12  ;;  %v1080_v63 = vsel %vm267_vm2, %v1058_v60, %v1063_v61 }
 0x1a9   : > { %3879 = vmatpush3.bf16.msra.mxu1 %v1080_v63  ;;  %4067 = vmatmul.mubr.msk.bf16.gmra.mrb[4].mxu0 %vm351_vm7, %v4518_v9  ;;  %v4525_v9 = vld [vmem:[%s5762_s2 + $0x164] ss:$0 sps:$4 sm:$0x11]  }
 0x1aa   : > { %v1067_v2 = vpop.permute.xlu1 %1066  ;;  %v1065_v13 = vpop.permute.xlu0 %1064  ;;  %3880 = vmatprep.subr.bf16.mxu1 %v4599_v0  ;;  %4070 = vmatprep.mubr.msk.bf16.mxu0 %vm4605_vm0, %v4599_v0 }
 0x1ab   : > { %v1068_v5 = vsel %vm259_vm5, %v1065_v13, %v1067_v2 }
 0x1ac   : > { %1469 = vrot.lane.b32.xlu1 %v3462_v52, %s4602_s13  ;;  %1467 = vrot.lane.b32.xlu0 %v3461_v54, %s4602_s13 }
 0x1ae   : > { %v1072_v3 = vpop.permute.xlu1 %1071  ;;  %v1070_v4 = vpop.permute.xlu0 %1069 }
 0x1af   : > { %v1073_v6 = vsel %vm265_vm6, %v1070_v4, %v1072_v3  ;;  %v3083_v3 = vld [vmem:[%s5763_s3 + $0x20] sm:$0x1] }
 0x1b0   : > { %1474 = vrot.lane.b32.xlu1 %v3462_v52, %s4603_s14  ;;  %1472 = vrot.lane.b32.xlu0 %v3461_v54, %s4603_s14  ;;  %v1084_v8 = vsel %vm267_vm2, %v1068_v5, %v1073_v6 }
 0x1b1   : > { %3881 = vmatpush3.bf16.msra.mxu1 %v1084_v8  ;;  %4071 = vmatmul.mubr.msk.bf16.gmra.mrb[8].mxu0 %vm351_vm7, %v4519_v20  ;;  %v4523_v20 = vld [vmem:[%s5762_s2 + $0x8c] sm:$0xff]   ;;  %v3114_v8 = vld [vmem:[%s5764_s4] sm:$0xff] }
 0x1b2   : > { %v2548_v28 = vpop.permute.xlu1 %2547  ;;  %v2546_v12 = vpop.permute.xlu0 %2545  ;;  %3894 = vmatprep.subr.bf16.mxu1 %v4599_v0  ;;  %4080 = vmatprep.mubr.msk.bf16.mxu0 %vm4605_vm0, %v4599_v0 }
 0x1b3   : > { %v2549_v14 = vsel %vm241_vm1, %v2546_v12, %v2548_v28  ;;  %v3115_v28 = vld [vmem:[%s5764_s4 + $0x8] sm:$0xff] }
 0x1b4   : > { %1479 = vrot.lane.b32.xlu1 %v3462_v52, %s4604_s15  ;;  %1477 = vrot.lane.b32.xlu0 %v3461_v54, %s4604_s15  ;;  %v2572_v15 = vsel %vm267_vm2, %v5149_v38, %v2549_v14  ;;  %v4521_v38 = vld [vmem:[%s5762_s2 + $0x80] sm:$0xff]  }
 0x1b5   : > { %4075 = vmatpush3.bf16.msra.mxu0 %v2572_v15  ;;  %3883 = vmatmul.mubr.msk.bf16.vlgmr.msra.gmra.mrb[0].mxu1 %vm351_vm7, %v4517_v7  ;;  %v3079_v52 = vld [vmem:[%s5763_s3] sm:$0xff]  ;;  %v4526_v15 = vld [vmem:[%s5762_s2 + $0x94] sm:$0xff]  }
 0x1b6   : > { %v2553_v22 = vpop.permute.xlu1 %2552  ;;  %v2551_v39 = vpop.permute.xlu0 %2550  ;;  %4076 = vmatprep.subr.bf16.mxu0 %v4599_v0  ;;  %3886 = vmatprep.mubr.msk.bf16.mxu1 %vm4605_vm0, %v4599_v0 }
 0x1b7   : > { %v2554_v25 = vsel %vm247_vm3, %v2551_v39, %v2553_v22 }
 0x1b8   : > { %2955 = vrot.lane.b32.xlu1 %v3627_v17, %s4600_s11  ;;  %2953 = vrot.lane.b32.xlu0 %v3626_v18, %s4600_s11 }
 0x1ba   : > { %v2558_v23 = vpop.permute.xlu1 %2557  ;;  %v2556_v24 = vpop.permute.xlu0 %2555 }
 0x1bb   : > { %v2559_v26 = vsel %vm253_vm4, %v2556_v24, %v2558_v23  ;;  %v3118_v23 = vld [vmem:[%s5764_s4 + $0x20] sm:$0x1] }
 0x1bc   : > { %2960 = vrot.lane.b32.xlu1 %v3627_v17, %s4601_s12  ;;  %2958 = vrot.lane.b32.xlu0 %v3626_v18, %s4601_s12  ;;  %v2576_v27 = vsel %vm267_vm2, %v2554_v25, %v2559_v26 }
 0x1bd   : > { %4077 = vmatpush3.bf16.msra.mxu0 %v2576_v27  ;;  %3887 = vmatmul.mubr.msk.bf16.gmra.mrb[4].mxu1 %vm351_vm7, %v4521_v38  ;;  %v4528_v27 = vld [vmem:[%s5762_s2 + $0x9c] ss:$0 sps:$4 sm:$0x11]  }
 0x1be   : > { %v2563_v31 = vpop.permute.xlu1 %2562  ;;  %v2561_v16 = vpop.permute.xlu0 %2560  ;;  %4078 = vmatprep.subr.bf16.mxu0 %v4599_v0  ;;  %3890 = vmatprep.mubr.msk.bf16.mxu1 %vm4605_vm0, %v4599_v0 }
 0x1bf   : > { %v2564_v34 = vsel %vm259_vm5, %v2561_v16, %v2563_v31 }
 0x1c0   : > { %2965 = vrot.lane.b32.xlu1 %v3627_v17, %s4602_s13  ;;  %2963 = vrot.lane.b32.xlu0 %v3626_v18, %s4602_s13 }
 0x1c2   : > { %v2568_v32 = vpop.permute.xlu1 %2567  ;;  %v2566_v33 = vpop.permute.xlu0 %2565 }
 0x1c3   : > { %v2569_v35 = vsel %vm265_vm6, %v2566_v33, %v2568_v32 }
 0x1c4   : > { %2970 = vrot.lane.b32.xlu1 %v3627_v17, %s4603_s14  ;;  %2968 = vrot.lane.b32.xlu0 %v3626_v18, %s4603_s14  ;;  %v2580_v37 = vsel %vm267_vm2, %v2564_v34, %v2569_v35  ;;  %v4527_v34 = vld [vmem:[%s5762_s2 + $0x168] sm:$0xff]  }
 0x1c5   : > { %4079 = vmatpush3.bf16.msra.mxu0 %v2580_v37  ;;  %3891 = vmatmul.mubr.msk.bf16.gmra.mrb[8].mxu1 %vm351_vm7, %v4522_v46 }
 0x1c6   : > { %v1188_v10 = vpop.permute.xlu1 %1187  ;;  %v1186_v55 = vpop.permute.xlu0 %1185  ;;  %4092 = vmatprep.subr.bf16.mxu0 %v4599_v0  ;;  %3900 = vmatprep.mubr.msk.bf16.mxu1 %vm4605_vm0, %v4599_v0 }
 0x1c7   : > { %v1189_v41 = vsel %vm241_vm1, %v1186_v55, %v1188_v10 }
 0x1c8   : > { %2975 = vrot.lane.b32.xlu1 %v3627_v17, %s4604_s15  ;;  %2973 = vrot.lane.b32.xlu0 %v3626_v18, %s4604_s15  ;;  %v1212_v42 = vsel %vm267_vm2, %v5196_v1, %v1189_v41  ;;  %v3117_v17 = vld [vmem:[%s5764_s4 + $0x18] sm:$0xff] }
 0x1c9   : > { %3895 = vmatpush3.bf16.msra.mxu1 %v1212_v42  ;;  %4081 = vmatmul.mubr.msk.bf16.vlgmr.msra.gmra.mrb[0].mxu0 %vm351_vm7, %v4520_v40  ;;  %v4530_v42 = vld [vmem:[%s5762_s2 + $0x170] sm:$0xff]  }
 0x1ca   : > { %v1193_v43 = vpop.permute.xlu1 %1192  ;;  %v1191_v44 = vpop.permute.xlu0 %1190  ;;  %3896 = vmatprep.subr.bf16.mxu1 %v4599_v0  ;;  %4084 = vmatprep.mubr.msk.bf16.mxu0 %vm4605_vm0, %v4599_v0 }
 0x1cb   : > { %v1194_v49 = vsel %vm247_vm3, %v1191_v44, %v1193_v43 }
 0x1cc   : > { %3091 = vperm.xlu1 %4438, %v3080_v51   ;;  %3086 = vperm.xlu0 %4437, %v3079_v52  }
 0x1ce   : > { %v1198_v48 = vpop.permute.xlu1 %1197  ;;  %v1196_v62 = vpop.permute.xlu0 %1195 }
 0x1cf   : > { %v1199_v1 = vsel %vm253_vm4, %v1196_v62, %v1198_v48 }
 0x1d0   : > { %v1216_v50 = vsel %vm267_vm2, %v1194_v49, %v1199_v1  ;;  %3096 = vperm.xlu1 %4438, %v3081_v58   ;;  %3101 = vperm.xlu0 %4437, %v3082_v59   ;;  %v4532_v1 = vld [vmem:[%s5762_s2 + $0x178] ss:$0 sps:$4 sm:$0x11]  }
 0x1d1   : > { %3897 = vmatpush3.bf16.msra.mxu1 %v1216_v50  ;;  %4085 = vmatmul.mubr.msk.bf16.gmra.mrb[4].mxu0 %vm351_vm7, %v4524_v45 }
 0x1d2   : > { %v1203_v54 = vpop.permute.xlu1 %1202  ;;  %v1201_v57 = vpop.permute.xlu0 %1200  ;;  %3898 = vmatprep.subr.bf16.mxu1 %v4599_v0  ;;  %4088 = vmatprep.mubr.msk.bf16.mxu0 %vm4605_vm0, %v4599_v0 }
 0x1d3   : > { %v1204_v63 = vsel %vm259_vm5, %v1201_v57, %v1203_v54 }
 0x1d4   : > { %3106 = vperm.xlu1 %4438, %v3083_v3   ;;  %3121 = vperm.xlu0 %4437, %v3114_v8   ;;  %v4533_v8 = vld [vmem:[%s5762_s2 + $0xb0] ss:$0 sps:$4 sm:$0x11]  }
 0x1d6   : > { %v1208_v60 = vpop.permute.xlu1 %1207  ;;  %v1206_v61 = vpop.permute.xlu0 %1205 }
 0x1d7   : > { %v1209_v2 = vsel %vm265_vm6, %v1206_v61, %v1208_v60 }
 0x1d8   : > { %v1220_v13 = vsel %vm267_vm2, %v1204_v63, %v1209_v2  ;;  %3126 = vperm.xlu1 %4438, %v3115_v28   ;;  %v4531_v2 = vld [vmem:[%s5762_s2 + $0xa8] sm:$0xff]  }
 0x1d9   : > { %3899 = vmatpush3.bf16.msra.mxu1 %v1220_v13  ;;  %4089 = vmatmul.mubr.msk.bf16.gmra.mrb[8].mxu0 %vm351_vm7, %v4525_v9 }
 0x1da   : > { %v2684_v4 = vpop.permute.xlu1 %2683  ;;  %v2682_v5 = vpop.permute.xlu0 %2681  ;;  %3912 = vmatprep.subr.bf16.mxu1 %v4599_v0  ;;  %4098 = vmatprep.mubr.msk.bf16.mxu0 %vm4605_vm0, %v4599_v0 }
 0x1db   : > { %v2685_v6 = vsel %vm241_vm1, %v2682_v5, %v2684_v4 }
 0x1dc   : > { %v2708_v7 = vsel %vm267_vm2, %v5243_v30, %v2685_v6  ;;  %3901 = vmatmul.mubr.msk.bf16.vlgmr.msra.gmra.mrb[0].mxu1 %vm351_vm7, %v4523_v20  ;;  %v3116_v30 = vld [vmem:[%s5764_s4 + $0x10] sm:$0xff]  ;;  %3136 = vperm.xlu1 %4438, %v3117_v17  }
 0x1dd   : > { %4093 = vmatpush3.bf16.msra.mxu0 %v2708_v7  ;;  %3904 = vmatprep.mubr.msk.bf16.mxu1 %vm4605_vm0, %v4599_v0 }
 0x1de   : > { %v2689_v12 = vpop.permute.xlu1 %2688  ;;  %v2687_v14 = vpop.permute.xlu0 %2686  ;;  %4094 = vmatprep.subr.bf16.mxu0 %v4599_v0  ;;  %3131 = vperm.xlu0 %4437, %v3116_v30  }
 0x1df   : > { %v2690_v39 = vsel %vm247_vm3, %v2687_v14, %v2689_v12 }
 0x1e2   : > { %v2694_v18 = vpop.permute.xlu1 %2693  ;;  %v2692_v22 = vpop.permute.xlu0 %2691  ;;  %3141 = vperm.xlu0 %4437, %v3118_v23  }
 0x1e3   : > { %v2695_v38 = vsel %vm253_vm4, %v2692_v22, %v2694_v18 }
 0x1e4   : > { %v2712_v24 = vsel %vm267_vm2, %v2690_v39, %v2695_v38  ;;  %3905 = vmatmul.mubr.msk.bf16.gmra.mrb[4].mxu1 %vm351_vm7, %v4526_v15  ;;  %v4534_v15 = vld [vmem:[%s5762_s2 + $0x17c] sm:$0xff]  }
 0x1e5   : > { %4095 = vmatpush3.bf16.msra.mxu0 %v2712_v24  ;;  %3908 = vmatprep.mubr.msk.bf16.mxu1 %vm4605_vm0, %v4599_v0  ;;  %v4536_v24 = vld [vmem:[%s5762_s2 + $0x184] sm:$0xff]  }
 0x1e6   : > { %v2699_v25 = vpop.permute.xlu1 %2698  ;;  %v2697_v26 = vpop.permute.xlu0 %2696  ;;  %4096 = vmatprep.subr.bf16.mxu0 %v4599_v0 }
 0x1e7   : > { %v2700_v46 = vsel %vm259_vm5, %v2697_v26, %v2699_v25 }
 0x1ea   : > { %v2704_v31 = vpop.permute.xlu1 %2703  ;;  %v2702_v16 = vpop.permute.xlu0 %2701 }
 0x1eb   : > { %v2705_v32 = vsel %vm265_vm6, %v2702_v16, %v2704_v31 }
 0x1ec   : > { %v2716_v33 = vsel %vm267_vm2, %v2700_v46, %v2705_v32  ;;  %3909 = vmatmul.mubr.msk.bf16.gmra.mrb[8].mxu1 %vm351_vm7, %v4528_v27  ;;  %v4538_v32 = vld [vmem:[%s5762_s2 + $0x18c] ss:$0 sps:$4 sm:$0x11]  }
 0x1ed   : > { %4097 = vmatpush3.bf16.msra.mxu0 %v2716_v33  ;;  %3918 = vmatprep.mubr.msk.bf16.mxu1 %vm4605_vm0, %v4599_v0 }
 0x1ee   : > { %v1324_v35 = vpop.permute.xlu1 %1323  ;;  %v1322_v37 = vpop.permute.xlu0 %1321  ;;  %4110 = vmatprep.subr.bf16.mxu0 %v4599_v0 }
 0x1ef   : > { %v1325_v40 = vsel %vm241_vm1, %v1322_v37, %v1324_v35 }
 0x1f0   : > { %v1348_v10 = vsel %vm267_vm2, %v5290_v56, %v1325_v40  ;;  %4099 = vmatmul.mubr.msk.bf16.vlgmr.msra.gmra.mrb[0].mxu0 %vm351_vm7, %v4527_v34 }
 0x1f1   : > { %3913 = vmatpush3.bf16.msra.mxu1 %v1348_v10  ;;  %4102 = vmatprep.mubr.msk.bf16.mxu0 %vm4605_vm0, %v4599_v0  ;;  %v4535_v10 = vld [vmem:[%s5762_s2 + $0xb4] sm:$0xff]  }
 0x1f2   : > { %v1329_v55 = vpop.permute.xlu1 %1328  ;;  %v1327_v41 = vpop.permute.xlu0 %1326  ;;  %3914 = vmatprep.subr.bf16.mxu1 %v4599_v0 }
 0x1f3   : > { %v1330_v45 = vsel %vm247_vm3, %v1327_v41, %v1329_v55 }
 0x1f6   : > { %v1334_v43 = vpop.permute.xlu1 %1333  ;;  %v1332_v44 = vpop.permute.xlu0 %1331 }
 0x1f7   : > { %v1335_v56 = vsel %vm253_vm4, %v1332_v44, %v1334_v43 }
 0x1f8   : > { %v1352_v48 = vsel %vm267_vm2, %v1330_v45, %v1335_v56  ;;  %4103 = vmatmul.mubr.msk.bf16.gmra.mrb[4].mxu0 %vm351_vm7, %v4530_v42  ;;  %v4537_v56 = vld [vmem:[%s5762_s2 + $0xbc] sm:$0xff]  }
 0x1f9   : > { %3915 = vmatpush3.bf16.msra.mxu1 %v1352_v48  ;;  %4106 = vmatprep.mubr.msk.bf16.mxu0 %vm4605_vm0, %v4599_v0 }
 0x1fa   : > { %v1339_v62 = vpop.permute.xlu1 %1338  ;;  %v1337_v49 = vpop.permute.xlu0 %1336  ;;  %3916 = vmatprep.subr.bf16.mxu1 %v4599_v0 }
 0x1fb   : > { %v1340_v52 = vsel %vm259_vm5, %v1337_v49, %v1339_v62 }
 0x1fe   : > { %v1344_v50 = vpop.permute.xlu1 %1343  ;;  %v1342_v51 = vpop.permute.xlu0 %1341 }
 0x1ff   : > { %v1345_v54 = vsel %vm265_vm6, %v1342_v51, %v1344_v50 }
 0x200   : > { %v1356_v57 = vsel %vm267_vm2, %v1340_v52, %v1345_v54  ;;  %4107 = vmatmul.mubr.msk.bf16.gmra.mrb[8].mxu0 %vm351_vm7, %v4532_v1 }
 0x201   : > { %3917 = vmatpush3.bf16.msra.mxu1 %v1356_v57  ;;  %4116 = vmatprep.mubr.msk.bf16.mxu0 %vm4605_vm0, %v4599_v0 }
 0x202   : > { %v2820_v9 = vpop.permute.xlu1 %2819  ;;  %v2818_v58 = vpop.permute.xlu0 %2817  ;;  %3930 = vmatprep.subr.bf16.mxu1 %v4599_v0 }
 0x203   : > { %v2821_v59 = vsel %vm241_vm1, %v2818_v58, %v2820_v9  ;;  %v4541_v9 = vld [vmem:[%s5762_s2 + $0xd8] ss:$0 sps:$4 sm:$0x11]  }
 0x204   : > { %v2844_v60 = vsel %vm267_vm2, %v5337_v21, %v2821_v59  ;;  %3919 = vmatmul.mubr.msk.bf16.vlgmr.msra.gmra.mrb[0].mxu1 %vm351_vm7, %v4529_v19  ;;  %v4540_v19 = vld [vmem:[%s5762_s2 + $0x190] sm:$0xff]   ;;  %v4542_v58 = vld [vmem:[%s5762_s2 + $0x198] sm:$0xff]   ;;  %v4543_v59 = vld [vmem:[%s5762_s2 + $0x1a0] ss:$0 sps:$4 sm:$0x11]  }
 0x205   : > { %4111 = vmatpush3.bf16.msra.mxu0 %v2844_v60  ;;  %3922 = vmatprep.mubr.msk.bf16.mxu1 %vm4605_vm0, %v4599_v0 }
 0x206   : > { %v2825_v61 = vpop.permute.xlu1 %2824  ;;  %v2823_v63 = vpop.permute.xlu0 %2822  ;;  %4112 = vmatprep.subr.bf16.mxu0 %v4599_v0 }
 0x207   : > { %v2826_v3 = vsel %vm247_vm3, %v2823_v63, %v2825_v61 }
 0x20a   : > { %v2830_v13 = vpop.permute.xlu1 %2829  ;;  %v2828_v20 = vpop.permute.xlu0 %2827 }
 0x20b   : > { %v2831_v21 = vsel %vm253_vm4, %v2828_v20, %v2830_v13 }
 0x20c   : > { %v2848_v4 = vsel %vm267_vm2, %v2826_v3, %v2831_v21  ;;  %3923 = vmatmul.mubr.msk.bf16.gmra.mrb[4].mxu1 %vm351_vm7, %v4531_v2 }
 0x20d   : > { %4113 = vmatpush3.bf16.msra.mxu0 %v2848_v4  ;;  %3926 = vmatprep.mubr.msk.bf16.mxu1 %vm4605_vm0, %v4599_v0 }
 0x20e   : > { %v2835_v5 = vpop.permute.xlu1 %2834  ;;  %v2833_v6 = vpop.permute.xlu0 %2832  ;;  %4114 = vmatprep.subr.bf16.mxu0 %v4599_v0 }
 0x20f   : > { %v2836_v12 = vsel %vm259_vm5, %v2833_v6, %v2835_v5 }
 0x212   : > { %v2840_v7 = vpop.permute.xlu1 %2839  ;;  %v2838_v28 = vpop.permute.xlu0 %2837 }
 0x213   : > { %v2841_v14 = vsel %vm265_vm6, %v2838_v28, %v2840_v7  ;;  %v3159_v28 = vlaneseq }
 0x214   : > { %v2852_v30 = vsel %vm267_vm2, %v2836_v12, %v2841_v14  ;;  %3927 = vmatmul.mubr.msk.bf16.gmra.mrb[8].mxu1 %vm351_vm7, %v4533_v8 }
 0x215   : > { %4115 = vmatpush3.bf16.msra.mxu0 %v2852_v30  ;;  %3936 = vmatprep.mubr.msk.bf16.mxu1 %vm4605_vm0, %v4599_v0 }
 0x216   : > { %v1460_v17 = vpop.permute.xlu1 %1459  ;;  %v1458_v18 = vpop.permute.xlu0 %1457  ;;  %4128 = vmatprep.subr.bf16.mxu0 %v4599_v0 }
 0x217   : > { %v1461_v22 = vsel %vm241_vm1, %v1458_v18, %v1460_v17 }
 0x218   : > { %v1484_v39 = vsel %vm267_vm2, %v5384_v47, %v1461_v22  ;;  %4117 = vmatmul.mubr.msk.bf16.vlgmr.msra.gmra.mrb[0].mxu0 %vm351_vm7, %v4534_v15  ;;  %v3160_v22 = vand.u32 127, %v3159_v28 }
 0x219   : > { %3931 = vmatpush3.bf16.msra.mxu1 %v1484_v39  ;;  %4120 = vmatprep.mubr.msk.bf16.mxu0 %vm4605_vm0, %v4599_v0 }
 0x21a   : > { %v1465_v38 = vpop.permute.xlu1 %1464  ;;  %v1463_v23 = vpop.permute.xlu0 %1462  ;;  %3932 = vmatprep.subr.bf16.mxu1 %v4599_v0 }
 0x21b   : > { %v1466_v27 = vsel %vm247_vm3, %v1463_v23, %v1465_v38  ;;  %v3162_v38 = vstv %s3161_s18 }
 0x21c   : > { %vm5721_vm8 = vcmp.lt.s32.totalorder %v3160_v22, %v3162_v38 }
 0x21e   : > { %v1470_v25 = vpop.permute.xlu1 %1469  ;;  %v1468_v26 = vpop.permute.xlu0 %1467 }
 0x21f   : > { %v1471_v47 = vsel %vm253_vm4, %v1468_v26, %v1470_v25 }
 0x220   : > { %v1488_v31 = vsel %vm267_vm2, %v1466_v27, %v1471_v47  ;;  %4121 = vmatmul.mubr.msk.bf16.gmra.mrb[4].mxu0 %vm351_vm7, %v4536_v24 }
 0x221   : > { %3933 = vmatpush3.bf16.msra.mxu1 %v1488_v31  ;;  %4124 = vmatprep.mubr.msk.bf16.mxu0 %vm4605_vm0, %v4599_v0 }
 0x222   : > { %v1475_v16 = vpop.permute.xlu1 %1474  ;;  %v1473_v46 = vpop.permute.xlu0 %1472  ;;  %3934 = vmatprep.subr.bf16.mxu1 %v4599_v0 }
 0x223   : > { %v1476_v35 = vsel %vm259_vm5, %v1473_v46, %v1475_v16 }
 0x226   : > { %v1480_v33 = vpop.permute.xlu1 %1479  ;;  %v1478_v34 = vpop.permute.xlu0 %1477 }
 0x227   : > { %v1481_v37 = vsel %vm265_vm6, %v1478_v34, %v1480_v33 }
 0x228   : > { %v1492_v40 = vsel %vm267_vm2, %v1476_v35, %v1481_v37  ;;  %4125 = vmatmul.mubr.msk.bf16.gmra.mrb[8].mxu0 %vm351_vm7, %v4538_v32 }
 0x229   : > { %3935 = vmatpush3.bf16.msra.mxu1 %v1492_v40  ;;  %4134 = vmatprep.mubr.msk.bf16.mxu0 %vm4605_vm0, %v4599_v0 }
 0x22a   : > { %v2956_v55 = vpop.permute.xlu1 %2955  ;;  %v2954_v41 = vpop.permute.xlu0 %2953  ;;  %4146 = vmatprep.subr.bf16.mxu1 %v4599_v0 }
 0x22b   : > { %v2957_v42 = vsel %vm241_vm1, %v2954_v41, %v2956_v55 }
 0x22c   : > { %3937 = vmatmul.mubr.msk.bf16.vlgmr.msra.gmra.mrb[0].mxu1 %vm351_vm7, %v4535_v10  ;;  %v2980_v43 = vsel %vm267_vm2, %v5431_v11, %v2957_v42 }
 0x22d   : > { %4149 = vmatpush3.bf16.msra.mxu1 %v4808_v29  ;;  %4129 = vmatpush3.bf16.msra.mxu0 %v2980_v43 }
 0x22e   : > { %v2961_v44 = vpop.permute.xlu1 %2960  ;;  %v2959_v45 = vpop.permute.xlu0 %2958  ;;  %4147 = vmatprep.subr.bf16.mxu1 %v4599_v0  ;;  %3940 = vmatprep.mubr.msk.bf16.mxu1 %vm4605_vm0, %v4599_v0 }
 0x22f   : > { %4130 = vmatprep.subr.bf16.mxu0 %v4599_v0  ;;  %v2962_v29 = vsel %vm247_vm3, %v2959_v45, %v2961_v44 }
 0x231   : > { %4150 = vmatpush3.bf16.msra.mxu1 %v4820_v36  ;;  %v4539_v36 = vld [vmem:[%s5762_s2 + $0xc4] ss:$0 sps:$4 sm:$0x11]  }
 0x232   : > { %v2966_v48 = vpop.permute.xlu1 %2965  ;;  %v2964_v11 = vpop.permute.xlu0 %2963  ;;  %4148 = vmatprep.subr.bf16.mxu1 %v4599_v0 }
 0x233   : > { %v2967_v62 = vsel %vm253_vm4, %v2964_v11, %v2966_v48 }
 0x234   : > { %3941 = vmatmul.mubr.msk.bf16.gmra.mrb[4].mxu1 %vm351_vm7, %v4537_v56  ;;  %v2984_v49 = vsel %vm267_vm2, %v2962_v29, %v2967_v62 }
 0x235   : > { %4151 = vmatpush3.bf16.msra.mxu1 %v4846_v53  ;;  %4131 = vmatpush3.bf16.msra.mxu0 %v2984_v49 }
 0x236   : > { %v2971_v1 = vpop.permute.xlu1 %2970  ;;  %v2969_v50 = vpop.permute.xlu0 %2968  ;;  %3944 = vmatprep.mubr.msk.bf16.mxu1 %vm4605_vm0, %v4599_v0  ;;  %4132 = vmatprep.subr.bf16.mxu0 %v4599_v0 }
 0x237   : > { %v2972_v54 = vsel %vm259_vm5, %v2969_v50, %v2971_v1 }
 0x23a   : > { %v2976_v51 = vpop.permute.xlu1 %2975  ;;  %v2974_v52 = vpop.permute.xlu0 %2973 }
 0x23b   : > { %v2977_v57 = vsel %vm265_vm6, %v2974_v52, %v2976_v51 }
 0x23c   : > { %3945 = vmatmul.mubr.msk.bf16.gmra.mrb[8].mxu1 %vm351_vm7, %v4539_v36  ;;  %v2988_v53 = vsel %vm267_vm2, %v2972_v54, %v2977_v57 }
 0x23d   : > { %4133 = vmatpush3.bf16.msra.mxu0 %v2988_v53  ;;  %3962 = vmatprep.mubr.msk.bf16.mxu1 %vm4605_vm0, %v4599_v0 }
 0x240   : > { %4135 = vmatmul.mubr.msk.bf16.vlgmr.msra.gmra.mrb[0].mxu0 %vm351_vm7, %v4540_v19 }
 0x241   : > { %4138 = vmatprep.mubr.msk.bf16.mxu0 %vm4605_vm0, %v4599_v0 }
 0x248   : > { %3963 = vmatmul.mubr.msk.bf16.vlgmr.msra.gmra.mrb[8].mxu1 %vm351_vm7, %v4541_v9  ;;  %4139 = vmatmul.mubr.msk.bf16.gmra.mrb[4].mxu0 %vm351_vm7, %v4542_v58 }
 0x249   : > { %4142 = vmatprep.mubr.msk.bf16.mxu0 %vm4605_vm0, %v4599_v0 }
 0x24b   : > { %v3092_v20 = vpop.permute.xlu1 %3091  ;;  %v3087_v5 = vpop.permute.xlu0 %3086 }
 0x24f   : > { %v3097_v0 = vpop.permute.xlu1 %3096  ;;  %v3102_v6 = vpop.permute.xlu0 %3101 }
 0x250   : > { %4143 = vmatmul.mubr.msk.bf16.gmra.mrb[8].mxu0 %vm351_vm7, %v4543_v59 }
 0x253   : > { %v3107_v7 = vpop.permute.xlu1 %3106  ;;  %v3122_v39 = vpop.permute.xlu0 %3121 }
 0x257   : > { %v3127_v25 = vpop.permute.xlu1 %3126 }
 0x25b   : > { %v3137_v29 = vpop.permute.xlu1 %3136 }
 0x25d   : > { %v3132_v45 = vpop.permute.xlu0 %3131 }
 0x261   : > { %v3142_v58 = vpop.permute.xlu0 %3141 }
 0x2ff   : > { %v1556_v60 = vpop.f32.mrb[0].mxu1 }
 0x300   : > { %v3938_v61 = vpop.f32.mrb[1].mxu1 }
 0x301   : > { %v1559_v63 = vpop.f32.mrb[2].mxu1 }
 0x302   : > { %v3939_v2 = vpop.f32.mrb[3].mxu1 }
 0x307   : > { %v1564_v13 = vpop.f32.mrb[4].mxu1 }
 0x308   : > { %v3942_v3 = vpop.f32.mrb[5].mxu1 }
 0x309   : > { %v1567_v21 = vpop.f32.mrb[6].mxu1 }
 0x30a   : > { %v3943_v4 = vpop.f32.mrb[7].mxu1 }
 0x313   : > { %v3052_v8 = vpop.f32.mrb[0].mxu0 }
 0x314   : > { %v4152_v12 = vadd.f32 %v3052_v8, %v1556_v60  ;;  %v4136_v14 = vpop.f32.mrb[1].mxu0 }
 0x315   : > { %v3055_v30 = vpop.f32.mrb[2].mxu0 }
 0x316   : > { %v3109_v15 = vmul.f32 %v4152_v12, %v3087_v5  ;;  %v4153_v17 = vadd.f32 %v3055_v30, %v1559_v63  ;;  %v4137_v18 = vpop.f32.mrb[3].mxu0 }
 0x318   : > { %v3144_v23 = vadd.f32 %v3122_v39, %v3109_v15  ;;  %v3110_v24 = vmul.f32 %v4153_v17, %v3092_v20 }
 0x31a   : > { %v3149_v26 = vmax.f32 %v3144_v23, 0.0  ;;  %v3145_v27 = vadd.f32 %v3127_v25, %v3110_v24 }
 0x31b   : > { %v1708_v31 = vpop.f32.mrb[8].mxu1  ;;  %v3060_v16 = vpop.f32.mrb[4].mxu0 }
 0x31c   : > { %v3154_v46 = vmin.f32 %v3149_v26, 20.0  ;;  %v3150_v32 = vmax.f32 %v3145_v27, 0.0  ;;  %v4154_v33 = vadd.f32 %v3060_v16, %v1564_v13  ;;  %v3964_v34 = vpop.f32.mrb[9].mxu1  ;;  %v4140_v35 = vpop.f32.mrb[5].mxu0 }
 0x31d   : > { %v1711_v37 = vpop.f32.mrb[10].mxu1  ;;  %v3063_v40 = vpop.f32.mrb[6].mxu0 }
 0x31e   : > { %v3164_v10 = vsel %vm5721_vm8, %v3154_v46, 0.0  ;;  %v3155_v55 = vmin.f32 %v3150_v32, 20.0  ;;  %v3111_v41 = vmul.f32 %v4154_v33, %v3097_v0  ;;  %v4155_v42 = vadd.f32 %v3063_v40, %v1567_v21  ;;  %v3965_v43 = vpop.f32.mrb[11].mxu1  ;;  %v4141_v44 = vpop.f32.mrb[7].mxu0 }
 0x31f   : > { %3169 = vst [vmem:[%s5728_s29] sm:$0xff] %v3164_v10 }
 0x320   : > { %v3165_v56 = vsel %vm5721_vm8, %v3155_v55, 0.0  ;;  %v3146_v48 = vadd.f32 %v3132_v45, %v3111_v41  ;;  %v3112_v11 = vmul.f32 %v4155_v42, %v3102_v6 }
 0x321   : > { %3170 = vst [vmem:[%s5728_s29 + $0x8] sm:$0xff] %v3165_v56 }
 0x322   : > { %v3151_v62 = vmax.f32 %v3146_v48, 0.0  ;;  %v3147_v49 = vadd.f32 %v3137_v29, %v3112_v11 }
 0x323   : > { %v3068_v1 = vpop.f32.mrb[8].mxu0 }
 0x324   : > { %v3156_v50 = vmin.f32 %v3151_v62, 20.0  ;;  %v3152_v36 = vmax.f32 %v3147_v49, 0.0  ;;  %v4156_v51 = vadd.f32 %v3068_v1, %v1708_v31  ;;  %v4144_v52 = vpop.f32.mrb[9].mxu0 }
 0x325   : > { %v3071_v54 = vpop.f32.mrb[10].mxu0 }
 0x326   : > { %v3166_v57 = vsel %vm5721_vm8, %v3156_v50, 0.0  ;;  %v3157_v53 = vmin.f32 %v3152_v36, 20.0  ;;  %v3113_v19 = vmul.f32 %v4156_v51, %v3107_v7  ;;  %v4145_v9 = vpop.f32.mrb[11].mxu0 }
 0x327   : > { %3171 = vst [vmem:[%s5728_s29 + $0x10] sm:$0xff] %v3166_v57 }
 0x328   : > { %v3167_v59 = vsel %vm5721_vm8, %v3157_v53, 0.0  ;;  %v3148_v60 = vadd.f32 %v3142_v58, %v3113_v19 }
 0x329   : > { %3172 = vst [vmem:[%s5728_s29 + $0x18] sm:$0xff] %v3167_v59 }
 0x32a   : > { %v3153_v61 = vmax.f32 %v3148_v60, 0.0 }
 0x32c   : > { %v3158_v63 = vmin.f32 %v3153_v61, 20.0 }
 0x32e   : > { %v3168_v2 = vsel %vm5721_vm8, %v3158_v63, 0.0 }
 0x32f   : > { %3173 = vst [vmem:[%s5728_s29 + $0x20] sm:$0x1] %v3168_v2 }
 0x330 PF: > { %s21_s26 = sadd.s32 1, %s4596_s26   ;;  %s5768_s23 = smov %s4588_s25 }
 0x331   : > { %p18_p12 = scmp.ge.s32.totalorder %s21_s26, 18   ;;  %s5769_s24 = smov %s4592_s0 }
 0x332   : > { %s5770_s25 = smov %s5773_s27  ;;  %s5771_s0 = smov %s5777_s28 }
 0x333   :  { %20 = sbr.rel (!%p18_p12) target bundleno = 18 (0x12), region = 107 }

</bundles_post_ra>
